<compile_context>
chip_gen: v6e
topology: v6e:2x2x1
jax: 0.10.0
libtpu: 0.0.40
codegen_flags: <defaults>
</compile_context>

<pallas_src>
import functools

import numpy as np
import jax
import jax.numpy as jnp
from jax.experimental import pallas as pl
from jax.experimental.pallas import tpu as pltpu

E = 128            # plm_embed_size stand-in (4096 in the original)
NUM_ACTIONS = 7    # action_head output dim
S_DIM = 8          # per-component state feature dim
MAX_T = 8          # time-embedding table size (dt_win_length)
N_SLOTS = 7        # [return, s1..s5, action] per timestep
N_VAL = 1 + 5 * S_DIM + 1                     # 42 raw feature columns
D_IN = N_VAL + N_SLOTS + MAX_T                # 57 fused feature columns
HEAD_PAD = 128     # lane-padded action-head output width (== E, sliced to 7)
EPS = 1e-5
NEG_INF = -1e30

assert HEAD_PAD == E  # vecs packing below relies on this


# ---------------------------------------------------------------------------
# Fully fused forward kernel (BB batch elements per grid step)
# ---------------------------------------------------------------------------
def _fused_forward_kernel(BB, LP, T,
                          feats_ref, wemb_ref, vecs_ref, b1_ref, mask_ref,
                          sel_ref, wqkv_ref, wo_ref, w1_ref, w2_ref,
                          wh_ref, o_ref):
    feats = feats_ref[0]                                   # (BB*LP, D_IN) bf16
    M = BB * LP

    ln_g = vecs_ref[0:1, :]
    ln_b = vecs_ref[1:2, :]
    b2 = vecs_ref[2:3, :]
    b_h = vecs_ref[3:4, :]

    # --- fused embeddings: 7 per-slot linears + biases + time lookup in ONE
    #     (M, D_IN) @ (D_IN, E) matmul; rows are already interleaved ---------
    x = jnp.dot(feats, wemb_ref[...], preferred_element_type=jnp.float32)

    # --- embed_ln (LayerNorm over the embedding dim, f32) -------------------
    mu = jnp.mean(x, axis=-1, keepdims=True)
    var = jnp.mean((x - mu) ** 2, axis=-1, keepdims=True)
    x = (x - mu) * jax.lax.rsqrt(var + EPS) * ln_g + ln_b          # (M, E) f32

    # --- synthetic causal transformer block ---------------------------------
    # TODO(synk): the real frozen Llama + LoRA (PEFT) backbone and tokenizer
    # are not reproducible here; one causal attention + MLP block stands in
    # for `self.llm_model(inputs_embeds=...)`.
    x_bf = x.astype(jnp.bfloat16)
    qkv = jnp.dot(x_bf, wqkv_ref[...], preferred_element_type=jnp.float32)
    q = qkv[:, :E].astype(jnp.bfloat16).reshape(BB, LP, E)   # 1/sqrt(E) folded
    k = qkv[:, E:2 * E].astype(jnp.bfloat16).reshape(BB, LP, E)
    v = qkv[:, 2 * E:].astype(jnp.bfloat16).reshape(BB, LP, E)

    scores = jnp.einsum('bqd,bkd->bqk', q, k,
                        preferred_element_type=jnp.float32)       # (BB, LP, LP)
    scores = scores + mask_ref[...][None, :, :]                   # causal + pad
    scores = scores - jnp.max(scores, axis=-1, keepdims=True)
    p = jnp.exp(scores)
    p = p * pl.reciprocal(jnp.sum(p, axis=-1, keepdims=True), approx=True)

    attn = jnp.einsum('bqk,bkd->bqd', p.astype(jnp.bfloat16), v,
                      preferred_element_type=jnp.float32)         # (BB, LP, E)
    attn = attn.reshape(M, E).astype(jnp.bfloat16)
    h = x + jnp.dot(attn, wo_ref[...], preferred_element_type=jnp.float32)

    # --- gather the action rows (positions (t+1)*7 - 2 == 7t + 5) -----------
    # Constant 0/1 selection matrix keeps the gather on the MXU.
    sel = jnp.dot(sel_ref[...], h.astype(jnp.bfloat16),
                  preferred_element_type=jnp.float32)             # (BB*T, E)

    # --- MLP (row-wise) applied only to the selected rows -------------------
    m = jnp.dot(sel.astype(jnp.bfloat16), w1_ref[...],
                preferred_element_type=jnp.float32) + b1_ref[...]
    m = jax.nn.gelu(m, approximate=True)
    hid = sel + jnp.dot(m.astype(jnp.bfloat16), w2_ref[...],
                        preferred_element_type=jnp.float32) + b2

    # --- action head (lane-padded to 128 for an unmasked store) -------------
    o_ref[0] = (jnp.dot(hid.astype(jnp.bfloat16), wh_ref[...],
                        preferred_element_type=jnp.float32) + b_h)


# ---------------------------------------------------------------------------
# Parameters (deterministic, synthetic)
# ---------------------------------------------------------------------------
def init_params(key):
    keys = jax.random.split(key, 16)
    s = 0.02
    return {
        "time_table": s * jax.random.normal(keys[0], (MAX_T, E), jnp.float32),
        "w_ret": s * jax.random.normal(keys[1], (1, E), jnp.float32),
        "b_ret": jnp.zeros((1, E), jnp.float32),
        "w_act": s * jax.random.normal(keys[2], (1, E), jnp.float32),
        "b_act": jnp.zeros((1, E), jnp.float32),
        "w_state": [s * jax.random.normal(keys[3 + i], (S_DIM, E), jnp.float32)
                    for i in range(5)],
        "b_state": [jnp.zeros((1, E), jnp.float32) for _ in range(5)],
        "ln_g": jnp.ones((1, E), jnp.float32),
        "ln_b": jnp.zeros((1, E), jnp.float32),
        "wqkv": s * jax.random.normal(keys[8], (E, 3 * E), jnp.float32),
        "wo": s * jax.random.normal(keys[9], (E, E), jnp.float32),
        "w1": s * jax.random.normal(keys[10], (E, 4 * E), jnp.float32),
        "b1": jnp.zeros((1, 4 * E), jnp.float32),
        "w2": s * jax.random.normal(keys[11], (4 * E, E), jnp.float32),
        "b2": jnp.zeros((1, E), jnp.float32),
        "w_head": s * jax.random.normal(keys[12], (E, NUM_ACTIONS), jnp.float32),
        "b_head": jnp.zeros((1, NUM_ACTIONS), jnp.float32),
    }


def build_fused_weights(p):
    """Assemble the block-structured embedding weight, fold the attention
    scale into Wq, pack the tiny bias vectors, cast matmul operands to bf16."""
    # rows 0..41 : per-slot embedding weights in interleave order
    # rows 42..48: per-slot biases (selected by the slot one-hot columns)
    # rows 49..56: time-embedding table (selected by the timestep one-hot)
    w_emb = jnp.concatenate(
        [p["w_ret"], *p["w_state"], p["w_act"],
         p["b_ret"], *p["b_state"], p["b_act"],
         p["time_table"]],
        axis=0).astype(jnp.bfloat16)

    # fold 1/sqrt(E) attention scale into the Wq column block (weight folding)
    scale = 1.0 / np.sqrt(float(E))
    wqkv = jnp.concatenate([p["wqkv"][:, :E] * scale, p["wqkv"][:, E:]],
                           axis=1).astype(jnp.bfloat16)

    w_head = jnp.zeros((E, HEAD_PAD), jnp.float32).at[:, :NUM_ACTIONS].set(p["w_head"])
    b_head = jnp.zeros((1, HEAD_PAD), jnp.float32).at[:, :NUM_ACTIONS].set(p["b_head"])

    # pack the (1, E) vectors used on the VPU (kept in f32) into one input
    vecs = jnp.concatenate([p["ln_g"], p["ln_b"], p["b2"], b_head], axis=0)  # (4, E)

    return dict(
        w_emb=w_emb,
        vecs=vecs,
        b1=p["b1"],
        wqkv=wqkv,
        wo=p["wo"].astype(jnp.bfloat16),
        w1=p["w1"].astype(jnp.bfloat16),
        w2=p["w2"].astype(jnp.bfloat16),
        w_head=w_head.astype(jnp.bfloat16),
    )


def build_feats(states, actions, returns, timesteps):
    """(B,T,5,S_DIM),(B,T,1),(B,T,1),(B,T) -> (B, 7T, D_IN) row features.

    Row 7t+j carries only slot j's raw features plus its slot one-hot and the
    timestep one-hot, so one matmul with the block-structured weight yields
    the interleaved embedded sequence (incl. biases and time embeddings).
    """
    B, T = timesteps.shape
    timesteps = jnp.clip(timesteps, 0, MAX_T - 1)      # nn.Embedding bounds
    vals = jnp.concatenate(
        [returns.reshape(B, T, 1),
         states.reshape(B, T, 5 * S_DIM),
         actions.reshape(B, T, 1)], axis=-1)                       # (B, T, 42)

    slot_mask = np.zeros((N_SLOTS, N_VAL), np.float32)
    slot_mask[0, 0] = 1.0                                          # return
    for s in range(5):                                             # states 1..5
        slot_mask[1 + s, 1 + s * S_DIM:1 + (s + 1) * S_DIM] = 1.0
    slot_mask[6, N_VAL - 1] = 1.0                                  # action
    slot_mask = jnp.asarray(slot_mask)

    val_rows = vals[:, :, None, :] * slot_mask[None, None]         # (B,T,7,42)
    slot_oh = jnp.broadcast_to(jnp.eye(N_SLOTS, dtype=jnp.float32),
                               (B, T, N_SLOTS, N_SLOTS))           # (B,T,7,7)
    time_oh = jax.nn.one_hot(timesteps, MAX_T, dtype=jnp.float32)  # (B,T,8)
    time_oh = jnp.broadcast_to(time_oh[:, :, None, :], (B, T, N_SLOTS, MAX_T))

    feats = jnp.concatenate([val_rows, slot_oh, time_oh], axis=-1)  # (B,T,7,D_IN)
    return feats.reshape(B, N_SLOTS * T, D_IN)


# ---------------------------------------------------------------------------
# Forward (mirrors Model.forward)
# ---------------------------------------------------------------------------
def model_forward(params, states, actions, returns, timesteps, labels=None):
    B, T = timesteps.shape
    L = N_SLOTS * T
    LP = ((L + 7) // 8) * 8                       # sublane-aligned seq length
    # TODO(synk): the original truncates stacked_inputs to the last
    # plm_embed_size tokens; with 7*T <= E that is a no-op (asserted here).
    assert L <= E, "sequence-truncation path not implemented"

    # batch folding: 2 grid steps when possible (uses both v7x TensorCores),
    # BB = B // grid_b batch elements folded into each step's matmuls.
    grid_b = 2 if (B >= 2 and B % 2 == 0) else 1
    BB = B // grid_b
    M = BB * LP

    feats = build_feats(states, actions, returns, timesteps)       # (B, L, D_IN)
    feats = jnp.pad(feats, ((0, 0), (0, LP - L), (0, 0)))
    feats = feats.astype(jnp.bfloat16).reshape(grid_b, M, D_IN)

    w = build_fused_weights(params)

    # constant additive causal mask (also masks the padded key columns)
    row = np.arange(LP)[:, None]
    col = np.arange(LP)[None, :]
    allowed = (col <= row) & (col < L)
    mask = jnp.asarray(np.where(allowed, 0.0, NEG_INF), dtype=jnp.float32)

    # constant 0/1 selection matrix gathering rows 7t+5 of each folded batch
    sel_np = np.zeros((BB * T, M), np.float32)
    for bb in range(BB):
        for t in range(T):
            sel_np[bb * T + t, bb * LP + N_SLOTS * t + (N_SLOTS - 2)] = 1.0
    sel_mat = jnp.asarray(sel_np, dtype=jnp.bfloat16)

    def full_spec(a):
        nd = a.ndim
        return pl.BlockSpec(a.shape, lambda g, _nd=nd: (0,) * _nd)

    # advisory cost estimate so XLA can schedule around the custom call
    flops_step = 2 * (M * D_IN * E + M * E * 3 * E + 2 * BB * LP * LP * E
                      + M * E * E + BB * T * M * E
                      + 2 * BB * T * E * 4 * E + BB * T * E * HEAD_PAD)
    trans_step = BB * LP * LP + M + BB * T * 4 * E + BB * LP
    bytes_acc = (feats.size * 2 + mask.size * 4 + sel_mat.size * 2
                 + w["w_emb"].size * 2 + w["vecs"].size * 4 + w["b1"].size * 4
                 + w["wqkv"].size * 2 + w["wo"].size * 2
                 + w["w1"].size * 2 + w["w2"].size * 2 + w["w_head"].size * 2
                 + grid_b * BB * T * HEAD_PAD * 4)
    cost = pl.CostEstimate(flops=grid_b * flops_step,
                           transcendentals=grid_b * trans_step,
                           bytes_accessed=int(bytes_acc))

    kernel = functools.partial(_fused_forward_kernel, BB, LP, T)

    out = pl.pallas_call(
        kernel,
        out_shape=jax.ShapeDtypeStruct((grid_b, BB * T, HEAD_PAD), jnp.float32),
        grid=(grid_b,),
        in_specs=[
            pl.BlockSpec((1, M, D_IN), lambda g: (g, 0, 0)),
            full_spec(w["w_emb"]), full_spec(w["vecs"]), full_spec(w["b1"]),
            full_spec(mask), full_spec(sel_mat),
            full_spec(w["wqkv"]), full_spec(w["wo"]),
            full_spec(w["w1"]), full_spec(w["w2"]),
            full_spec(w["w_head"]),
        ],
        out_specs=pl.BlockSpec((1, BB * T, HEAD_PAD), lambda g: (g, 0, 0)),
        compiler_params=pltpu.CompilerParams(
            dimension_semantics=("parallel",)),
        cost_estimate=cost,
    )(feats, w["w_emb"], w["vecs"], w["b1"], mask, sel_mat,
      w["wqkv"], w["wo"], w["w1"], w["w2"], w["w_head"])

    out = out.reshape(B, T, HEAD_PAD)
    return out[:, :, :NUM_ACTIONS]


# ---------------------------------------------------------------------------
if __name__ == "__main__":
    key = jax.random.PRNGKey(0)
    k_p, k_s, k_a, k_r, k_t = jax.random.split(key, 5)

    B, T = 4, 4
    params = init_params(k_p)

    states = jax.random.normal(k_s, (B, T, 5, S_DIM), jnp.float32)
    actions = jax.random.normal(k_a, (B, T, 1), jnp.float32)
    returns = jax.random.normal(k_r, (B, T, 1), jnp.float32)
    timesteps = jax.random.randint(k_t, (B, T), 0, MAX_T).astype(jnp.int32)
    labels = jnp.zeros((B, T), jnp.int32)   # unused by forward (as in the original)

    fwd = jax.jit(model_forward)
    out = fwd(params, states, actions, returns, timesteps, labels)
    out = jax.block_until_ready(out)
    assert out.shape == (B, T, NUM_ACTIONS), out.shape
    assert bool(jnp.all(jnp.isfinite(out)))
    print("KERNEL_OK")
</pallas_src>

<mosaic_0001>
module attributes {stable_mosaic.version = 11 : i64} {
  func.func @_fused_forward_kernel(%arg0: i32, %arg1: memref<1x64x57xbf16, #tpu.memory_space<vmem>>, %arg2: memref<57x128xbf16, #tpu.memory_space<vmem>>, %arg3: memref<4x128xf32, #tpu.memory_space<vmem>>, %arg4: memref<1x512xf32, #tpu.memory_space<vmem>>, %arg5: memref<32x32xf32, #tpu.memory_space<vmem>>, %arg6: memref<8x64xbf16, #tpu.memory_space<vmem>>, %arg7: memref<128x384xbf16, #tpu.memory_space<vmem>>, %arg8: memref<128x128xbf16, #tpu.memory_space<vmem>>, %arg9: memref<128x512xbf16, #tpu.memory_space<vmem>>, %arg10: memref<512x128xbf16, #tpu.memory_space<vmem>>, %arg11: memref<128x128xbf16, #tpu.memory_space<vmem>>, %arg12: memref<1x8x128xf32, #tpu.memory_space<vmem>>) attributes {dimension_semantics = [#tpu.dimension_semantics<parallel>], iteration_bounds = array<i64: 2>, scalar_prefetch = 0 : i64, scratch_operands = 0 : i64, tpu.core_type = #tpu.core_type<tc>, window_params = [{transform_indices = @transform_0, window_bounds = array<i64: 1, 64, 57>}, {pipeline_mode = #tpu.pipeline_mode<synchronous>, transform_indices = @transform_1, window_bounds = array<i64: 57, 128>}, {pipeline_mode = #tpu.pipeline_mode<synchronous>, transform_indices = @transform_2, window_bounds = array<i64: 4, 128>}, {pipeline_mode = #tpu.pipeline_mode<synchronous>, transform_indices = @transform_3, window_bounds = array<i64: 1, 512>}, {pipeline_mode = #tpu.pipeline_mode<synchronous>, transform_indices = @transform_4, window_bounds = array<i64: 32, 32>}, {pipeline_mode = #tpu.pipeline_mode<synchronous>, transform_indices = @transform_5, window_bounds = array<i64: 8, 64>}, {pipeline_mode = #tpu.pipeline_mode<synchronous>, transform_indices = @transform_6, window_bounds = array<i64: 128, 384>}, {pipeline_mode = #tpu.pipeline_mode<synchronous>, transform_indices = @transform_7, window_bounds = array<i64: 128, 128>}, {pipeline_mode = #tpu.pipeline_mode<synchronous>, transform_indices = @transform_8, window_bounds = array<i64: 128, 512>}, {pipeline_mode = #tpu.pipeline_mode<synchronous>, transform_indices = @transform_9, window_bounds = array<i64: 512, 128>}, {pipeline_mode = #tpu.pipeline_mode<synchronous>, transform_indices = @transform_10, window_bounds = array<i64: 128, 128>}, {transform_indices = @transform_11, window_bounds = array<i64: 1, 8, 128>}]} {
    %c0 = arith.constant 0 : index
    %c0_0 = arith.constant 0 : index
    %c0_1 = arith.constant 0 : index
    %0 = vector.load %arg1[%c0, %c0_0, %c0_1] : memref<1x64x57xbf16, #tpu.memory_space<vmem>>, vector<1x64x57xbf16>
    %1 = vector.shape_cast %0 : vector<1x64x57xbf16> to vector<64x57xbf16>
    %c0_2 = arith.constant 0 : index
    %c0_3 = arith.constant 0 : index
    %2 = vector.load %arg3[%c0_2, %c0_3] : memref<4x128xf32, #tpu.memory_space<vmem>>, vector<1x128xf32>
    %c1 = arith.constant 1 : index
    %c0_4 = arith.constant 0 : index
    %3 = vector.load %arg3[%c1, %c0_4] : memref<4x128xf32, #tpu.memory_space<vmem>>, vector<1x128xf32>
    %c2 = arith.constant 2 : index
    %c0_5 = arith.constant 0 : index
    %4 = vector.load %arg3[%c2, %c0_5] : memref<4x128xf32, #tpu.memory_space<vmem>>, vector<1x128xf32>
    %c3 = arith.constant 3 : index
    %c0_6 = arith.constant 0 : index
    %5 = vector.load %arg3[%c3, %c0_6] : memref<4x128xf32, #tpu.memory_space<vmem>>, vector<1x128xf32>
    %c0_7 = arith.constant 0 : index
    %c0_8 = arith.constant 0 : index
    %6 = vector.load %arg2[%c0_7, %c0_8] : memref<57x128xbf16, #tpu.memory_space<vmem>>, vector<57x128xbf16>
    %cst = arith.constant dense<0.000000e+00> : vector<64x128xf32>
    %7 = tpu.matmul %1, %6, %cst {dimension_numbers = #tpu.dot_dimension_numbers<[1], [0], [0], [1], [0, 0, 1, 1], [], []>} : vector<64x57xbf16>, vector<57x128xbf16>, vector<64x128xf32> -> vector<64x128xf32>
    %cst_9 = arith.constant dense<0.000000e+00> : vector<64xf32>
    %8 = vector.multi_reduction <add>, %7, %cst_9 [1] : vector<64x128xf32> to vector<64xf32>
    %9 = vector.shape_cast %8 : vector<64xf32> to vector<64x1xf32>
    %cst_10 = arith.constant 1.280000e+02 : f32
    %10 = vector.broadcast %cst_10 : f32 to vector<64x1xf32>
    %11 = arith.divf %9, %10 : vector<64x1xf32>
    %12 = vector.broadcast %11 : vector<64x1xf32> to vector<64x128xf32>
    %13 = arith.subf %7, %12 : vector<64x128xf32>
    %14 = arith.mulf %13, %13 : vector<64x128xf32>
    %cst_11 = arith.constant dense<0.000000e+00> : vector<64xf32>
    %15 = vector.multi_reduction <add>, %14, %cst_11 [1] : vector<64x128xf32> to vector<64xf32>
    %16 = vector.shape_cast %15 : vector<64xf32> to vector<64x1xf32>
    %cst_12 = arith.constant 1.280000e+02 : f32
    %17 = vector.broadcast %cst_12 : f32 to vector<64x1xf32>
    %18 = arith.divf %16, %17 : vector<64x1xf32>
    %19 = vector.broadcast %11 : vector<64x1xf32> to vector<64x128xf32>
    %20 = arith.subf %7, %19 : vector<64x128xf32>
    %cst_13 = arith.constant 9.99999974E-6 : f32
    %21 = vector.broadcast %cst_13 : f32 to vector<64x1xf32>
    %22 = arith.addf %18, %21 : vector<64x1xf32>
    %23 = math.rsqrt %22 : vector<64x1xf32>
    %24 = vector.broadcast %23 : vector<64x1xf32> to vector<64x128xf32>
    %25 = arith.mulf %20, %24 : vector<64x128xf32>
    %26 = vector.broadcast %2 : vector<1x128xf32> to vector<64x128xf32>
    %27 = arith.mulf %25, %26 : vector<64x128xf32>
    %28 = vector.broadcast %3 : vector<1x128xf32> to vector<64x128xf32>
    %29 = arith.addf %27, %28 : vector<64x128xf32>
    %30 = arith.truncf %29 : vector<64x128xf32> to vector<64x128xbf16>
    %c0_14 = arith.constant 0 : index
    %c0_15 = arith.constant 0 : index
    %31 = vector.load %arg7[%c0_14, %c0_15] : memref<128x384xbf16, #tpu.memory_space<vmem>>, vector<128x384xbf16>
    %cst_16 = arith.constant dense<0.000000e+00> : vector<64x384xf32>
    %32 = tpu.matmul %30, %31, %cst_16 {dimension_numbers = #tpu.dot_dimension_numbers<[1], [0], [0], [1], [0, 0, 1, 1], [], []>} : vector<64x128xbf16>, vector<128x384xbf16>, vector<64x384xf32> -> vector<64x384xf32>
    %33 = vector.extract_strided_slice %32 {offsets = [0, 0], sizes = [64, 128], strides = [1, 1]} : vector<64x384xf32> to vector<64x128xf32>
    %34 = arith.truncf %33 : vector<64x128xf32> to vector<64x128xbf16>
    %35 = vector.shape_cast %34 : vector<64x128xbf16> to vector<2x32x128xbf16>
    %36 = vector.extract_strided_slice %32 {offsets = [0, 128], sizes = [64, 128], strides = [1, 1]} : vector<64x384xf32> to vector<64x128xf32>
    %37 = arith.truncf %36 : vector<64x128xf32> to vector<64x128xbf16>
    %38 = vector.shape_cast %37 : vector<64x128xbf16> to vector<2x32x128xbf16>
    %39 = vector.extract_strided_slice %32 {offsets = [0, 256], sizes = [64, 128], strides = [1, 1]} : vector<64x384xf32> to vector<64x128xf32>
    %40 = arith.truncf %39 : vector<64x128xf32> to vector<64x128xbf16>
    %41 = vector.shape_cast %40 : vector<64x128xbf16> to vector<2x32x128xbf16>
    "tpu.trace_start"() <{level = 10 : i32, message = "bqd,bkd->bqk"}> : () -> ()
    %cst_17 = arith.constant dense<0.000000e+00> : vector<2x32x32xf32>
    %42 = tpu.matmul %35, %38, %cst_17 {dimension_numbers = #tpu.dot_dimension_numbers<[2], [2], [1], [1], [0, 0, 0, 1, 1, 1], [0], [0]>} : vector<2x32x128xbf16>, vector<2x32x128xbf16>, vector<2x32x32xf32> -> vector<2x32x32xf32>
    "tpu.trace_stop"() : () -> ()
    %c0_18 = arith.constant 0 : index
    %c0_19 = arith.constant 0 : index
    %43 = vector.load %arg5[%c0_18, %c0_19] : memref<32x32xf32, #tpu.memory_space<vmem>>, vector<32x32xf32>
    %44 = vector.shape_cast %43 : vector<32x32xf32> to vector<1x32x32xf32>
    %45 = vector.broadcast %44 : vector<1x32x32xf32> to vector<2x32x32xf32>
    %46 = arith.addf %42, %45 : vector<2x32x32xf32>
    %cst_20 = arith.constant dense<0xFF800000> : vector<2x32xf32>
    %47 = vector.multi_reduction <maximumf>, %46, %cst_20 [2] : vector<2x32x32xf32> to vector<2x32xf32>
    %48 = vector.shape_cast %47 : vector<2x32xf32> to vector<2x32x1xf32>
    %49 = vector.broadcast %48 : vector<2x32x1xf32> to vector<2x32x32xf32>
    %50 = arith.subf %46, %49 : vector<2x32x32xf32>
    %51 = math.exp %50 : vector<2x32x32xf32>
    %cst_21 = arith.constant dense<0.000000e+00> : vector<2x32xf32>
    %52 = vector.multi_reduction <add>, %51, %cst_21 [2] : vector<2x32x32xf32> to vector<2x32xf32>
    %53 = vector.shape_cast %52 : vector<2x32xf32> to vector<2x32x1xf32>
    %54 = tpu.reciprocal %53 {approx = true} : vector<2x32x1xf32> -> vector<2x32x1xf32>
    %55 = vector.broadcast %54 : vector<2x32x1xf32> to vector<2x32x32xf32>
    %56 = arith.mulf %51, %55 : vector<2x32x32xf32>
    %57 = arith.truncf %56 : vector<2x32x32xf32> to vector<2x32x32xbf16>
    "tpu.trace_start"() <{level = 10 : i32, message = "bqk,bkd->bqd"}> : () -> ()
    %cst_22 = arith.constant dense<0.000000e+00> : vector<2x32x128xf32>
    %58 = tpu.matmul %57, %41, %cst_22 {dimension_numbers = #tpu.dot_dimension_numbers<[2], [1], [1], [2], [0, 0, 0, 1, 1, 2], [0], [0]>} : vector<2x32x32xbf16>, vector<2x32x128xbf16>, vector<2x32x128xf32> -> vector<2x32x128xf32>
    "tpu.trace_stop"() : () -> ()
    %59 = vector.shape_cast %58 : vector<2x32x128xf32> to vector<64x128xf32>
    %60 = arith.truncf %59 : vector<64x128xf32> to vector<64x128xbf16>
    %c0_23 = arith.constant 0 : index
    %c0_24 = arith.constant 0 : index
    %61 = vector.load %arg8[%c0_23, %c0_24] : memref<128x128xbf16, #tpu.memory_space<vmem>>, vector<128x128xbf16>
    %cst_25 = arith.constant dense<0.000000e+00> : vector<64x128xf32>
    %62 = tpu.matmul %60, %61, %cst_25 {dimension_numbers = #tpu.dot_dimension_numbers<[1], [0], [0], [1], [0, 0, 1, 1], [], []>} : vector<64x128xbf16>, vector<128x128xbf16>, vector<64x128xf32> -> vector<64x128xf32>
    %63 = arith.addf %29, %62 : vector<64x128xf32>
    %c0_26 = arith.constant 0 : index
    %c0_27 = arith.constant 0 : index
    %64 = vector.load %arg6[%c0_26, %c0_27] : memref<8x64xbf16, #tpu.memory_space<vmem>>, vector<8x64xbf16>
    %65 = arith.truncf %63 : vector<64x128xf32> to vector<64x128xbf16>
    %cst_28 = arith.constant dense<0.000000e+00> : vector<8x128xf32>
    %66 = tpu.matmul %64, %65, %cst_28 {dimension_numbers = #tpu.dot_dimension_numbers<[1], [0], [0], [1], [0, 0, 1, 1], [], []>} : vector<8x64xbf16>, vector<64x128xbf16>, vector<8x128xf32> -> vector<8x128xf32>
    %67 = arith.truncf %66 : vector<8x128xf32> to vector<8x128xbf16>
    %c0_29 = arith.constant 0 : index
    %c0_30 = arith.constant 0 : index
    %68 = vector.load %arg9[%c0_29, %c0_30] : memref<128x512xbf16, #tpu.memory_space<vmem>>, vector<128x512xbf16>
    %cst_31 = arith.constant dense<0.000000e+00> : vector<8x512xf32>
    %69 = tpu.matmul %67, %68, %cst_31 {dimension_numbers = #tpu.dot_dimension_numbers<[1], [0], [0], [1], [0, 0, 1, 1], [], []>} : vector<8x128xbf16>, vector<128x512xbf16>, vector<8x512xf32> -> vector<8x512xf32>
    %c0_32 = arith.constant 0 : index
    %c0_33 = arith.constant 0 : index
    %70 = vector.load %arg4[%c0_32, %c0_33] : memref<1x512xf32, #tpu.memory_space<vmem>>, vector<1x512xf32>
    %71 = vector.broadcast %70 : vector<1x512xf32> to vector<8x512xf32>
    %72 = arith.addf %69, %71 : vector<8x512xf32>
    %73 = arith.mulf %72, %72 : vector<8x512xf32>
    %74 = arith.mulf %72, %73 : vector<8x512xf32>
    %cst_34 = arith.constant 4.471500e-02 : f32
    %75 = vector.broadcast %cst_34 : f32 to vector<8x512xf32>
    %76 = arith.mulf %75, %74 : vector<8x512xf32>
    %77 = arith.addf %72, %76 : vector<8x512xf32>
    %cst_35 = arith.constant 0.797884583 : f32
    %78 = vector.broadcast %cst_35 : f32 to vector<8x512xf32>
    %79 = arith.mulf %78, %77 : vector<8x512xf32>
    %80 = math.tanh %79 : vector<8x512xf32>
    %cst_36 = arith.constant 1.000000e+00 : f32
    %81 = vector.broadcast %cst_36 : f32 to vector<8x512xf32>
    %82 = arith.addf %81, %80 : vector<8x512xf32>
    %cst_37 = arith.constant 5.000000e-01 : f32
    %83 = vector.broadcast %cst_37 : f32 to vector<8x512xf32>
    %84 = arith.mulf %83, %82 : vector<8x512xf32>
    %85 = arith.mulf %72, %84 : vector<8x512xf32>
    %86 = arith.truncf %85 : vector<8x512xf32> to vector<8x512xbf16>
    %c0_38 = arith.constant 0 : index
    %c0_39 = arith.constant 0 : index
    %87 = vector.load %arg10[%c0_38, %c0_39] : memref<512x128xbf16, #tpu.memory_space<vmem>>, vector<512x128xbf16>
    %cst_40 = arith.constant dense<0.000000e+00> : vector<8x128xf32>
    %88 = tpu.matmul %86, %87, %cst_40 {dimension_numbers = #tpu.dot_dimension_numbers<[1], [0], [0], [1], [0, 0, 1, 1], [], []>} : vector<8x512xbf16>, vector<512x128xbf16>, vector<8x128xf32> -> vector<8x128xf32>
    %89 = arith.addf %66, %88 : vector<8x128xf32>
    %90 = vector.broadcast %4 : vector<1x128xf32> to vector<8x128xf32>
    %91 = arith.addf %89, %90 : vector<8x128xf32>
    %92 = arith.truncf %91 : vector<8x128xf32> to vector<8x128xbf16>
    %c0_41 = arith.constant 0 : index
    %c0_42 = arith.constant 0 : index
    %93 = vector.load %arg11[%c0_41, %c0_42] : memref<128x128xbf16, #tpu.memory_space<vmem>>, vector<128x128xbf16>
    %cst_43 = arith.constant dense<0.000000e+00> : vector<8x128xf32>
    %94 = tpu.matmul %92, %93, %cst_43 {dimension_numbers = #tpu.dot_dimension_numbers<[1], [0], [0], [1], [0, 0, 1, 1], [], []>} : vector<8x128xbf16>, vector<128x128xbf16>, vector<8x128xf32> -> vector<8x128xf32>
    %95 = vector.broadcast %5 : vector<1x128xf32> to vector<8x128xf32>
    %96 = arith.addf %94, %95 : vector<8x128xf32>
    %c0_44 = arith.constant 0 : index
    %c0_45 = arith.constant 0 : index
    %c0_46 = arith.constant 0 : index
    %97 = vector.load %arg12[%c0_44, %c0_45, %c0_46] : memref<1x8x128xf32, #tpu.memory_space<vmem>>, vector<1x8x128xf32>
    %98 = vector.shape_cast %97 : vector<1x8x128xf32> to vector<8x128xf32>
    %99 = vector.shape_cast %96 : vector<8x128xf32> to vector<1x8x128xf32>
    tpu.vector_store %arg12[%c0_44, %c0_45, %c0_46], %99 {strides = array<i32>} : memref<1x8x128xf32, #tpu.memory_space<vmem>>, vector<1x8x128xf32>,
    return
  }
  func.func @transform_0(%arg0: i32) -> (i32, i32, i32) {
    %c0_i32 = arith.constant 0 : i32
    %c0_i32_0 = arith.constant 0 : i32
    %c0_i32_1 = arith.constant 0 : i32
    return %arg0, %c0_i32, %c0_i32_0 : i32, i32, i32
  }
  func.func @transform_1(%arg0: i32) -> (i32, i32) {
    %c0_i32 = arith.constant 0 : i32
    %c0_i32_0 = arith.constant 0 : i32
    %c0_i32_1 = arith.constant 0 : i32
    return %c0_i32, %c0_i32_0 : i32, i32
  }
  func.func @transform_2(%arg0: i32) -> (i32, i32) {
    %c0_i32 = arith.constant 0 : i32
    %c0_i32_0 = arith.constant 0 : i32
    %c0_i32_1 = arith.constant 0 : i32
    return %c0_i32, %c0_i32_0 : i32, i32
  }
  func.func @transform_3(%arg0: i32) -> (i32, i32) {
    %c0_i32 = arith.constant 0 : i32
    %c0_i32_0 = arith.constant 0 : i32
    %c0_i32_1 = arith.constant 0 : i32
    return %c0_i32, %c0_i32_0 : i32, i32
  }
  func.func @transform_4(%arg0: i32) -> (i32, i32) {
    %c0_i32 = arith.constant 0 : i32
    %c0_i32_0 = arith.constant 0 : i32
    %c0_i32_1 = arith.constant 0 : i32
    return %c0_i32, %c0_i32_0 : i32, i32
  }
  func.func @transform_5(%arg0: i32) -> (i32, i32) {
    %c0_i32 = arith.constant 0 : i32
    %c0_i32_0 = arith.constant 0 : i32
    %c0_i32_1 = arith.constant 0 : i32
    return %c0_i32, %c0_i32_0 : i32, i32
  }
  func.func @transform_6(%arg0: i32) -> (i32, i32) {
    %c0_i32 = arith.constant 0 : i32
    %c0_i32_0 = arith.constant 0 : i32
    %c0_i32_1 = arith.constant 0 : i32
    return %c0_i32, %c0_i32_0 : i32, i32
  }
  func.func @transform_7(%arg0: i32) -> (i32, i32) {
    %c0_i32 = arith.constant 0 : i32
    %c0_i32_0 = arith.constant 0 : i32
    %c0_i32_1 = arith.constant 0 : i32
    return %c0_i32, %c0_i32_0 : i32, i32
  }
  func.func @transform_8(%arg0: i32) -> (i32, i32) {
    %c0_i32 = arith.constant 0 : i32
    %c0_i32_0 = arith.constant 0 : i32
    %c0_i32_1 = arith.constant 0 : i32
    return %c0_i32, %c0_i32_0 : i32, i32
  }
  func.func @transform_9(%arg0: i32) -> (i32, i32) {
    %c0_i32 = arith.constant 0 : i32
    %c0_i32_0 = arith.constant 0 : i32
    %c0_i32_1 = arith.constant 0 : i32
    return %c0_i32, %c0_i32_0 : i32, i32
  }
  func.func @transform_10(%arg0: i32) -> (i32, i32) {
    %c0_i32 = arith.constant 0 : i32
    %c0_i32_0 = arith.constant 0 : i32
    %c0_i32_1 = arith.constant 0 : i32
    return %c0_i32, %c0_i32_0 : i32, i32
  }
  func.func @transform_11(%arg0: i32) -> (i32, i32, i32) {
    %c0_i32 = arith.constant 0 : i32
    %c0_i32_0 = arith.constant 0 : i32
    %c0_i32_1 = arith.constant 0 : i32
    return %arg0, %c0_i32, %c0_i32_0 : i32, i32, i32
  }
}

</mosaic_0001>

<bundles_post_ra>
// kernel: model_forward.1
= control target key start
LH: loop header
LB: loop body
LE: loop exit
PB: predicated region body
PF: predicated region fallthrough
CT: control target
= control target key end

     0   :  { %s3633_s0 = inlined_call_operand.vmem [shape: bf16[2,64,57], index: 0, kind: input, shape index: {}]   ;;  %s3634_s1 = inlined_call_operand.vmem [shape: bf16[57,128], index: 1, kind: input, shape index: {}]   ;;  %s3635_s2 = inlined_call_operand.vmem [shape: f32[4,128], index: 2, kind: input, shape index: {}]   ;;  %s3636_s3 = inlined_call_operand.vmem [shape: f32[1,512], index: 3, kind: input, shape index: {}]   ;;  %s3637_s4 = inlined_call_operand.vmem [shape: f32[32,32], index: 4, kind: input, shape index: {}]   ;;  %s3638_s5 = inlined_call_operand.vmem [shape: bf16[8,64], index: 5, kind: input, shape index: {}]   ;;  %s3639_s6 = inlined_call_operand.vmem [shape: bf16[128,384], index: 6, kind: input, shape index: {}]   ;;  %s3640_s7 = inlined_call_operand.vmem [shape: bf16[128,128], index: 7, kind: input, shape index: {}]   ;;  %s3641_s8 = inlined_call_operand.vmem [shape: bf16[128,512], index: 8, kind: input, shape index: {}]   ;;  %s3642_s9 = inlined_call_operand.vmem [shape: bf16[512,128], index: 9, kind: input, shape index: {}]   ;;  %s3643_s10 = inlined_call_operand.vmem [shape: bf16[128,128], index: 10, kind: input, shape index: {}]   ;;  %s3644_s11 = inlined_call_operand.hbm [shape: f32[2,8,128], index: 11, kind: output, shape index: {}]  }
   0x1   :  { %3645 = sst [smem:[#allocation5_spill]] %s3633_s0 }
   0x2   :  { %3646 = sst [smem:[#allocation6_spill]] %s3634_s1 }
   0x3   :  { %16 = vsyncpa [#allocation3], 0 }
   0x4   :  { %18 = vsyncpa [#allocation3 + $0x1], 0  ;;  %s3051_s17 = smov 0   ;;  %s3053_s18 = smov 0  }
   0x5   :  { %s3055_s19 = smov 0   ;;  %s3057_s20 = smov 0  }
   0x6 LB: > { %s3072_s21 = sadd.s32 4294967295, %s2984_s20   ;;  %s2318_s22 = sadd.s32 4294967294, %s2984_s20   ;;  %s2984_s20 = sphi %s3057_s20, %s3654_s20   ;;  %s2980_s19 = sphi %s3055_s19, %s3653_s19   ;;  %s2976_s18 = sphi %s3053_s18, %s3652_s18   ;;  %s2972_s17 = sphi %s3051_s17, %s3651_s17  }
   0x7   : > { %s3076_s23 = sadd.s32 1, %s2984_s20   ;;  %s267_s24 = sadd.s32 1, %s2980_s19 }
   0x8   : > { %s264_s25 = ssub.s32 %s2984_s20, %s3076_s23  ;;  %p277_p0 = scmp.ne.s32.totalorder %s2980_s19, %s2976_s18 }
   0x9   : > { %p265_p1 = scmp.eq.s32.totalorder %s264_s25, 0  ;;  %p278_p2 = scmp.eq.s32.totalorder %s3072_s21, 1 }
   0xa   : > { %p283_p3 = scmp.ne.s32.totalorder %s2976_s18, %s2972_s17  ;;  %p284_p4 = scmp.eq.s32.totalorder %s2318_s22, 1 }
   0xb   : > { %s3087_s26 = scalar_select %p265_p1, %s2980_s19, %s267_s24  }
   0xc   : > { %p3089_p5 = por %p278_p2, %p277_p0  ;;  %p3093_p6 = por %p284_p4, %p283_p3 }
   0xd   : > { %p2321_p7 = scmp.ge.s32.totalorder %s2984_s20, 1  ;;  %p340_p8 = scmp.lt.s32.totalorder %s2984_s20, 3 }
   0xf   : > { %p341_p9 = pnand %p2321_p7, %p340_p8 }
  0x10   : > { %s3649_s1 = sld [smem:[#allocation6_spill]] (!%p341_p9)  ;;  %p380_p10 = scmp.lt.s32.totalorder (!%p341_p9), %s3072_s21, 1 }
  0x11   : > { %344 = sbr.rel (%p341_p9) target bundleno = 2569 (0xa09), region = 64  ;;  %s3650_s0 = sld [smem:[#allocation5_spill]] (!%p341_p9) }
  0x12   : > { %s377_s25 = sand.u32 (!%p341_p9), 1, %s2976_s18   ;;  %s2451_s13 = sshll.u32 (!%p341_p9), %s3072_s21, 7 }
  0x16   : > { %v2732_v0 = vld [vmem:[%s3649_s1 + $0x18] sm:$0x1f]   ;;  %vm462_vm0 = vcmask 1043456   ;;  %vm463_vm1 = vcmask 1044480   ;;  %v2986_v1 = vmov 65535   ;;  %v2733_v4 = vld [vmem:[%s3649_s1 + $0x10] sm:$0xff]  }
  0x17   : > { %v464_v2 = vsel %vm462_vm0, 4294967295, %v2986_v1  ;;  %v2734_v6 = vld [vmem:[%s3649_s1 + $0x8] sm:$0xff]   ;;  %s381_s16 = scalar_select %p380_p10, %s3072_s21, 1  ;;  %vm449_vm2 = vcmask 465920   ;;  %v2735_v8 = vld [vmem:[%s3649_s1] sm:$0xff]   ;;  %vm1063_vm3 = vcmask 261120  }
  0x18   : > { %v465_v3 = vsel %vm463_vm1, %v464_v2, 0  ;;  %v2740_v20 = vld [vmem:[%s3639_s6 + $0xac] ss:$12 sps:$4 sm:$0xff]   ;;  %v2742_v21 = vld [vmem:[%s3639_s6 + $0xa8] ss:$12 sps:$4 sm:$0xff]   ;;  %vm2989_vm4 = vmmov 0  }
  0x19   : > { %v467_v5 = vand.u32 %v2732_v0, %v465_v3  ;;  %s2454_s22 = sshll.u32 %s381_s16, 5  ;;  %811 = vmatprep.subr.bf16.mxu1 %v2740_v20  ;;  %v2743_v52 = vld [vmem:[%s3639_s6 + $0x94] ss:$12 sps:$4 sm:$0xff]   ;;  %v2745_v53 = vld [vmem:[%s3639_s6 + $0xb0] ss:$12 sps:$4 sm:$0xff]   ;;  %vm1412_vm5 = vcmask 523264   ;;  %s3592_s16 = scalar_lea.hbm %s3644_s11, %s2451_s13 }
  0x1a   : > { %s384_s29 = scalar_lea.vmem %s3650_s0, %s2454_s22  ;;  %812 = vmatpush1.bf16.msra.mxu1 %v2742_v21  ;;  %v2746_v54 = vld [vmem:[%s3639_s6 + $0x90] ss:$12 sps:$4 sm:$0xff]   ;;  %v2749_v58 = vld [vmem:[%s3639_s6 + $0x98] ss:$12 sps:$4 sm:$0xff]   ;;  %v2753_v61 = vld [vmem:[%s3639_s6 + $0x80] ss:$12 sps:$4 sm:$0xff]  }
  0x1b   : > { %2561 = vmatprep.subr.bf16.mxu0 %v467_v5  ;;  %v2736_v7 = vld [vmem:[%s384_s29] sm:$0xff]   ;;  %v2737_v9 = vld [vmem:[%s384_s29 + $0x8] sm:$0xff]   ;;  %v2738_v10 = vld [vmem:[%s384_s29 + $0x10] sm:$0xff]   ;;  %813 = vmatprep.subr.bf16.mxu1 %v2743_v52  ;;  %s2246_s22 = scalar_lea.sflag [#allocation3], %s377_s25  ;;  %s2990_s21 = smov [#allocation2]  }
  0x1c   : > { %2562 = vmatpush3.bf16.msra.mxu0 %v467_v5  ;;  %2569 = vmatprep.mubr.msk.bf16.mxu0 %vm449_vm2, %v2736_v7  ;;  %v2739_v11 = vld [vmem:[%s384_s29 + $0x18] sm:$0xff]   ;;  %v2751_v60 = vld [vmem:[%s3639_s6 + $0x64] ss:$12 sps:$4 sm:$0xff]   ;;  %v2754_v62 = vld [vmem:[%s3639_s6 + $0x60] ss:$12 sps:$4 sm:$0xff]   ;;  %s2322_s29 = sshll.u32 %s377_s25, 3 }
  0x1d   : > { %2563 = vmatprep.subr.bf16.mxu0 %v2733_v4  ;;  %v2747_v57 = vld [vmem:[%s3639_s6 + $0x7c] ss:$12 sps:$4 sm:$0xff]   ;;  %v2750_v59 = vld [vmem:[%s3639_s6 + $0x78] ss:$12 sps:$4 sm:$0xff]   ;;  %v2759_v2 = vld [vmem:[%s3639_s6 + $0x34] ss:$12 sps:$4 sm:$0xff]  }
  0x1e   : > { %814 = vmatpush1.bf16.msra.mxu1 %v2746_v54  ;;  %v2755_v63 = vld [vmem:[%s3639_s6 + $0x4c] ss:$12 sps:$4 sm:$0xff]   ;;  %v2757_v0 = vld [vmem:[%s3639_s6 + $0x68] ss:$12 sps:$4 sm:$0xff]   ;;  %v2761_v3 = vld [vmem:[%s3639_s6 + $0x50] ss:$12 sps:$4 sm:$0xff]  }
  0x1f   : > { %815 = vmatprep.subr.bf16.mxu1 %v2747_v57  ;;  %v2758_v1 = vld [vmem:[%s3639_s6 + $0x48] ss:$12 sps:$4 sm:$0xff]   ;;  %v2766_v7 = vld [vmem:[%s3639_s6 + $0x18] ss:$12 sps:$4 sm:$0xff]   ;;  %v2338_v52 = vld [vmem:[%s3635_s2 + $0x1] ss:$0 sm:$0xff] }
  0x20   : > { %2564 = vmatpush3.bf16.msra.mxu0 %v2733_v4  ;;  %v2762_v4 = vld [vmem:[%s3639_s6 + $0x30] ss:$12 sps:$4 sm:$0xff]   ;;  %s379_s14 = scalar_lea.vmem [#allocation2], %s2322_s29  ;;  %s2928_s29 = sshll.u32 %s2990_s21, 4  ;;  %s2929_s29 = int_to_ptr.vmem [resolvable:$false] %s2928_s29 }
  0x21   : > { %2565 = vmatprep.subr.bf16.mxu0 %v2734_v6  ;;  %v2763_v5 = vld [vmem:[%s3639_s6 + $0x1c] ss:$12 sps:$4 sm:$0xff]   ;;  %s2259_s0 = sshll.u32 %s379_s14, 4  ;;  %s2930_s30 = scalar_lea.vmem %s2929_s29, 256  ;;  %s3594_s0 = int_to_ptr.vmem [resolvable:$true] %s2259_s0 }
  0x22   : > { %816 = vmatpush1.bf16.msra.mxu1 %v2750_v59  ;;  %s2924_s24 = scalar_lea.vmem %s3594_s0, 128  ;;  %p2931_p0 = scmp.lt.s32.totalorder %s3594_s0, %s2929_s29 }
  0x23   : > { %817 = vmatprep.subr.bf16.mxu1 %v2751_v60  ;;  %p2925_p11 = scmp.ne.s32.totalorder %s3594_s0, %s2924_s24  ;;  %p2932_p1 = scmp.lt.s32.totalorder %s2930_s30, %s2924_s24 }
  0x24   : > { %2566 = vmatpush3.bf16.msra.mxu0 %v2734_v6  ;;  %v2765_v6 = vld [vmem:[%s3639_s6 + $0x38] ss:$12 sps:$4 sm:$0xff]  }
  0x25   : > { %2567 = vmatprep.subr.bf16.mxu0 %v2735_v8  ;;  %p2926_p12 = pnand %p2925_p11, %p3089_p5  ;;  %p2933_p2 = por %p2932_p1, %p2931_p0 }
  0x26   : > { %818 = vmatpush1.bf16.msra.mxu1 %v2754_v62 }
  0x27   : > { %819 = vmatprep.subr.bf16.mxu1 %v2755_v63  ;;  %p2927_p13 = pneg %p2926_p12 }
  0x28   : > { %2568 = vmatpush3.bf16.msra.mxu0 %v2735_v8  ;;  %v2767_v8 = vld [vmem:[%s3639_s6 + $0x4] ss:$12 sps:$4 sm:$0xff]  }
  0x29   : > { %2577 = vmatprep.subr.bf16.mxu0 %v2745_v53  ;;  %p2934_p3 = pnand %p2933_p2, %p2927_p13 }
  0x2a   : > { %820 = vmatpush1.bf16.msra.mxu1 %v2758_v1 }
  0x2b   : > { %2570 = vmatmul.mubr.msk.bf16.vlgmr.msra.gmra.mxu0 %vm449_vm2, %v2737_v9  ;;  %821 = vmatprep.subr.bf16.mxu1 %v2759_v2  ;;  %v2769_v9 = vld [vmem:[%s3639_s6 + $0x20] ss:$12 sps:$4 sm:$0xff]  }
  0x2c   : > { %2573 = vmatprep.mubr.msk.bf16.mxu0 %vm449_vm2, %v2738_v10  ;;  %2578 = vmatpush3.bf16.msra.mxu0 %v2745_v53  ;;  %v2770_v10 = vld [vmem:[%s3639_s6] ss:$12 sps:$4 sm:$0xff]  }
  0x2d   : > { %2579 = vmatprep.subr.bf16.mxu0 %v2749_v58 }
  0x2e   : > { %822 = vmatpush1.bf16.msra.mxu1 %v2762_v4 }
  0x2f   : > { %823 = vmatprep.subr.bf16.mxu1 %v2763_v5 }
  0x30   : > { %2580 = vmatpush3.bf16.msra.mxu0 %v2749_v58 }
  0x31   : > { %2581 = vmatprep.subr.bf16.mxu0 %v2753_v61 }
  0x32   : > { %824 = vmatpush1.bf16.msra.mxu1 %v2766_v7 }
  0x33   : > { %2574 = vmatmul.mubr.msk.bf16.gmra.mxu0 %vm449_vm2, %v2739_v11  ;;  %825 = vmatprep.subr.bf16.mxu1 %v2767_v8  ;;  %v2987_v11 = vmov 0  }
  0x34   : > { %2582 = vmatpush3.bf16.msra.mxu0 %v2753_v61  ;;  %843 = vmatprep.mubr.bf16.mxu1 %v2987_v11 }
  0x35   : > { %2583 = vmatprep.subr.bf16.mxu0 %v2757_v0 }
  0x36   : > { %826 = vmatpush1.bf16.msra.mxu1 %v2770_v10 }
  0x38   : > { %2584 = vmatpush3.bf16.msra.mxu0 %v2757_v0 }
  0x39   : > { %2585 = vmatprep.subr.bf16.mxu0 %v2761_v3 }
  0x3c   : > { %2586 = vmatpush3.bf16.msra.mxu0 %v2761_v3 }
  0x3d   : > { %2587 = vmatprep.subr.bf16.mxu0 %v2765_v6 }
  0x40   : > { %2588 = vmatpush3.bf16.msra.mxu0 %v2765_v6 }
  0x41   : > { %2589 = vmatprep.subr.bf16.mxu0 %v2769_v9 }
  0x44   : > { %2590 = vmatpush3.bf16.msra.mxu0 %v2769_v9 }
  0xeb   : > { %v2571_v12 = vpop.f32.mrf.mxu0 }
  0xec   : > { %538 = vadd.xlane.f32.xlu1 %v2571_v12 }
  0xed   : > { %v503_v13 = vpop.f32.mrf.mxu0 }
  0xee   : > { %534 = vadd.xlane.f32.xlu0 %v503_v13 }
  0xef   : > { %v2572_v14 = vpop.f32.mrf.mxu0 }
  0xf0   : > { %540 = vadd.xlane.f32.xlu1 %v2572_v14 }
  0xf1   : > { %v506_v15 = vpop.f32.mrf.mxu0 }
  0xf2   : > { %536 = vadd.xlane.f32.xlu0 %v506_v15 }
  0xf3   : > { %v2575_v16 = vpop.f32.mrf.mxu0 }
  0xf5   : > { %v519_v17 = vpop.f32.mrf.mxu0 }
  0xf6   : > { %542 = vadd.xlane.f32.xlu0 %v519_v17 }
  0xf7   : > { %v2576_v18 = vpop.f32.mrf.mxu0 }
  0xf9   : > { %v522_v19 = vpop.f32.mrf.mxu0 }
  0xfa   : > { %546 = vadd.xlane.f32.xlu0 %v2575_v16  ;;  %544 = vadd.xlane.f32.xlu1 %v522_v19 }
  0xfe   : > { %548 = vadd.xlane.f32.xlu1 %v2576_v18 }
 0x175   : > { %v539_v22 = vpop.xlane.xlu1 %538 }
 0x176   : > { %v553_v24 = vmul.f32 0.0078125, %v539_v22 }
 0x177   : > { %v535_v23 = vpop.xlane.xlu0 %534 }
 0x178   : > { %v551_v25 = vmul.f32 0.0078125, %v535_v23  ;;  %v3124_v29 = vsub.f32 %v2571_v12, %v553_v24  ;;  %v2771_v12 = vld [vmem:[%s3639_s6 + $0x8] ss:$12 sps:$4 sm:$0xff]  }
 0x179   : > { %v541_v26 = vpop.xlane.xlu1 %540  ;;  %2591 = vmatprep.subr.bf16.mxu0 %v2771_v12 }
 0x17a   : > { %v3122_v27 = vsub.f32 %v503_v13, %v551_v25  ;;  %v554_v30 = vmul.f32 0.0078125, %v541_v26  ;;  %v569_v37 = vmul.f32 %v3124_v29, %v3124_v29  ;;  %2592 = vmatpush3.bf16.msra.mxu0 %v2771_v12 }
 0x17b   : > { %v537_v28 = vpop.xlane.xlu0 %536 }
 0x17c   : > { %v552_v31 = vmul.f32 0.0078125, %v537_v28  ;;  %v567_v32 = vmul.f32 %v3122_v27, %v3122_v27  ;;  %v3130_v35 = vsub.f32 %v2572_v14, %v554_v30 }
 0x17e   : > { %v3128_v33 = vsub.f32 %v506_v15, %v552_v31  ;;  %575 = vadd.xlane.f32.xlu0 %v567_v32  ;;  %v570_v45 = vmul.f32 %v3130_v35, %v3130_v35 }
 0x17f   : > { %v543_v34 = vpop.xlane.xlu0 %542 }
 0x180   : > { %v555_v36 = vmul.f32 0.0078125, %v543_v34  ;;  %v568_v38 = vmul.f32 %v3128_v33, %v3128_v33 }
 0x182   : > { %v3136_v39 = vsub.f32 %v519_v17, %v555_v36  ;;  %579 = vadd.xlane.f32.xlu0 %v569_v37  ;;  %577 = vadd.xlane.f32.xlu1 %v568_v38 }
 0x183   : > { %v547_v40 = vpop.xlane.xlu0 %546  ;;  %v545_v41 = vpop.xlane.xlu1 %544 }
 0x184   : > { %v557_v42 = vmul.f32 0.0078125, %v547_v40  ;;  %v556_v43 = vmul.f32 0.0078125, %v545_v41  ;;  %v571_v44 = vmul.f32 %v3136_v39, %v3136_v39 }
 0x186   : > { %v3142_v46 = vsub.f32 %v2575_v16, %v557_v42  ;;  %v3144_v47 = vsub.f32 %v522_v19, %v556_v43  ;;  %583 = vadd.xlane.f32.xlu0 %v571_v44  ;;  %581 = vadd.xlane.f32.xlu1 %v570_v45  ;;  %v2337_v44 = vld [vmem:[%s3635_s2] ss:$0 sm:$0xff] }
 0x187   : > { %v549_v48 = vpop.xlane.xlu1 %548 }
 0x188   : > { %v558_v49 = vmul.f32 0.0078125, %v549_v48  ;;  %v573_v50 = vmul.f32 %v3142_v46, %v3142_v46  ;;  %v572_v51 = vmul.f32 %v3144_v47, %v3144_v47 }
 0x18a   : > { %v3159_v55 = vsub.f32 %v2576_v18, %v558_v49  ;;  %587 = vadd.xlane.f32.xlu0 %v573_v50  ;;  %585 = vadd.xlane.f32.xlu1 %v572_v51 }
 0x18c   : > { %v574_v56 = vmul.f32 %v3159_v55, %v3159_v55 }
 0x18e   : > { %589 = vadd.xlane.f32.xlu1 %v574_v56 }
 0x207   : > { %v576_v13 = vpop.xlane.xlu0 %575 }
 0x208   : > { %v591_v14 = vmul.f32 0.0078125, %v576_v13 }
 0x20a   : > { %v599_v15 = vadd.f32 1e-05, %v591_v14 }
 0x20b   : > { %v580_v16 = vpop.xlane.xlu0 %579  ;;  %v578_v17 = vpop.xlane.xlu1 %577 }
 0x20c   : > { %2868 = vrsqrt.f32 %v599_v15  ;;  %v593_v18 = vmul.f32 0.0078125, %v580_v16  ;;  %v592_v19 = vmul.f32 0.0078125, %v578_v17 }
 0x20e   : > { %v601_v20 = vadd.f32 1e-05, %v593_v18  ;;  %v600_v21 = vadd.f32 1e-05, %v592_v19 }
 0x20f   : > { %v584_v22 = vpop.xlane.xlu0 %583  ;;  %v582_v23 = vpop.xlane.xlu1 %581 }
 0x210   : > { %2870 = vrsqrt.f32 %v601_v20  ;;  %v595_v24 = vmul.f32 0.0078125, %v584_v22  ;;  %v594_v25 = vmul.f32 0.0078125, %v582_v23 }
 0x211   : > { %2872 = vrsqrt.f32 %v600_v21 }
 0x212   : > { %v603_v26 = vadd.f32 1e-05, %v595_v24  ;;  %v602_v28 = vadd.f32 1e-05, %v594_v25 }
 0x213   : > { %v588_v30 = vpop.xlane.xlu0 %587  ;;  %v586_v31 = vpop.xlane.xlu1 %585 }
 0x214   : > { %2874 = vrsqrt.f32 %v603_v26  ;;  %v597_v32 = vmul.f32 0.0078125, %v588_v30  ;;  %v596_v34 = vmul.f32 0.0078125, %v586_v31 }
 0x215   : > { %2876 = vrsqrt.f32 %v602_v28 }
 0x216   : > { %v605_v36 = vadd.f32 1e-05, %v597_v32  ;;  %v604_v37 = vadd.f32 1e-05, %v596_v34 }
 0x217   : > { %v590_v38 = vpop.xlane.xlu1 %589 }
 0x218   : > { %2878 = vrsqrt.f32 %v605_v36  ;;  %v598_v40 = vmul.f32 0.0078125, %v590_v38 }
 0x219   : > { %v2869_v41 = vpop.eup %2868  ;;  %2880 = vrsqrt.f32 %v604_v37 }
 0x21a   : > { %v606_v42 = vadd.f32 1e-05, %v598_v40  ;;  %v615_v43 = vmul.f32 %v2869_v41, %v3122_v27 }
 0x21c   : > { %2882 = vrsqrt.f32 %v606_v42  ;;  %v627_v51 = vmul.f32 %v2337_v44, %v615_v43 }
 0x21d   : > { %v2871_v45 = vpop.eup %2870 }
 0x21e   : > { %v2873_v48 = vpop.eup %2872  ;;  %v617_v49 = vmul.f32 %v2871_v45, %v3124_v29  ;;  %v3231_v58 = vadd.f32 %v2338_v52, %v627_v51 }
 0x21f   : > { %v616_v50 = vmul.f32 %v2873_v48, %v3128_v33 }
 0x220   : > { %v629_v27 = vmul.f32 %v2337_v44, %v617_v49 }
 0x221   : > { %v2875_v53 = vpop.eup %2874  ;;  %v628_v54 = vmul.f32 %v2337_v44, %v616_v50 }
 0x222   : > { %v2877_v56 = vpop.eup %2876  ;;  %v619_v60 = vmul.f32 %v2875_v53, %v3136_v39  ;;  %v3238_v63 = vadd.f32 %v2338_v52, %v629_v27  ;;  %v963_v27 = vld [vmem:[%s3637_s4 + $0x10] sm:$0xff] }
 0x223   : > { %v618_v57 = vmul.f32 %v2877_v56, %v3130_v35  ;;  %v3233_v59 = vadd.f32 %v2338_v52, %v628_v54  ;;  %v961_v56 = vld [vmem:[%s3637_s4] sm:$0xff] }
 0x224   : > { %v631_v2 = vmul.f32 %v2337_v44, %v619_v60 }
 0x225   : > { %v2879_v29 = vpop.eup %2878  ;;  %v647_v33 = vpack.c.bf16 %v3233_v59, %v3231_v58  ;;  %v630_v61 = vmul.f32 %v2337_v44, %v618_v57 }
 0x226   : > { %v2881_v62 = vpop.eup %2880  ;;  %v621_v0 = vmul.f32 %v2879_v29, %v3142_v46  ;;  %v3248_v7 = vadd.f32 %v2338_v52, %v631_v2 }
 0x227   : > { %844 = vmatmul.mubr.bf16.vlgmr.msra.gmra.mxu1 %v647_v33  ;;  %2593 = vmatprep.mubr.bf16.mxu0 %v647_v33  ;;  %v3241_v1 = vadd.f32 %v2338_v52, %v630_v61  ;;  %v620_v35 = vmul.f32 %v2881_v62, %v3144_v47  ;;  %v962_v33 = vld [vmem:[%s3637_s4 + $0x8] sm:$0xff] }
 0x228   : > { %853 = vmatprep.mubr.bf16.mxu1 %v2987_v11  ;;  %v633_v6 = vmul.f32 %v2337_v44, %v621_v0  ;;  %v964_v0 = vld [vmem:[%s3637_s4 + $0x18] sm:$0xff] }
 0x229   : > { %v2883_v39 = vpop.eup %2882  ;;  %v648_v3 = vpack.c.bf16 %v3241_v1, %v3238_v63  ;;  %v632_v4 = vmul.f32 %v2337_v44, %v620_v35 }
 0x22a   : > { %v622_v5 = vmul.f32 %v2883_v39, %v3159_v55  ;;  %v3254_v9 = vadd.f32 %v2338_v52, %v633_v6 }
 0x22b   : > { %2594 = vmatmul.mubr.bf16.vlgmr.msra.gmra.mxu0 %v648_v3  ;;  %v3250_v46 = vadd.f32 %v2338_v52, %v632_v4 }
 0x22c   : > { %v634_v8 = vmul.f32 %v2337_v44, %v622_v5 }
 0x22d   : > { %v649_v47 = vpack.c.bf16 %v3250_v46, %v3248_v7 }
 0x22e   : > { %v3256_v10 = vadd.f32 %v2338_v52, %v634_v8 }
 0x22f   : > { %854 = vmatmul.mubr.bf16.gmra.mxu1 %v648_v3  ;;  %2597 = vmatprep.mubr.bf16.mxu0 %v649_v47 }
 0x230   : > { %v650_v12 = vpack.c.bf16 %v3256_v10, %v3254_v9  ;;  %863 = vmatprep.mubr.bf16.mxu1 %v2987_v11 }
 0x233   : > { %2598 = vmatmul.mubr.bf16.gmra.mxu0 %v650_v12 }
 0x237   : > { %864 = vmatmul.mubr.bf16.gmra.mxu1 %v649_v47 }
 0x238   : > { %873 = vmatprep.mubr.bf16.mxu1 %v2987_v11 }
 0x23f   : > { %874 = vmatmul.mubr.bf16.gmra.mxu1 %v650_v12 }
 0x2e7   : > { %v845_v55 = vpop.f32.mrf.mxu1 }
 0x2e9   : > { %v847_v13 = vpop.f32.mrf.mxu1 }
 0x2eb   : > { %v849_v14 = vpop.f32.mrf.mxu1  ;;  %v2595_v18 = vpop.f32.mrf.mxu0 }
 0x2ec   : > { %v949_v15 = vpack.c.bf16 %v849_v14, %v845_v55 }
 0x2ed   : > { %v851_v16 = vpop.f32.mrf.mxu1  ;;  %v918_v21 = vpop.f32.mrf.mxu0 }
 0x2ee   : > { %2605 = vmatprep.mubr.bf16.mxu0 %v949_v15  ;;  %v953_v25 = vpack.c.bf16 %v851_v16, %v847_v13 }
 0x2ef   : > { %v855_v17 = vpop.f32.mrf.mxu1  ;;  %v2596_v26 = vpop.f32.mrf.mxu0 }
 0x2f0   : > { %v958_v37 = vpack.c.bf16 %v2596_v26, %v2595_v18 }
 0x2f1   : > { %v857_v19 = vpop.f32.mrf.mxu1  ;;  %v921_v32 = vpop.f32.mrf.mxu0 }
 0x2f2   : > { %v957_v48 = vpack.c.bf16 %v921_v32, %v918_v21 }
 0x2f3   : > { %v859_v20 = vpop.f32.mrf.mxu1  ;;  %v2599_v38 = vpop.f32.mrf.mxu0 }
 0x2f4   : > { %v950_v44 = vpack.c.bf16 %v859_v20, %v855_v17 }
 0x2f5   : > { %v861_v22 = vpop.f32.mrf.mxu1  ;;  %v3262_v42 = vpop.f32.mrf.mxu0 }
 0x2f6   : > { %v954_v23 = vpack.c.bf16 %v861_v22, %v857_v19 }
 0x2f7   : > { %v865_v24 = vpop.f32.mrf.mxu1  ;;  %v2600_v50 = vpop.f32.mrf.mxu0 }
 0x2f8   : > { %2601 = vmatprep.subr.bf16.mxu0 %v954_v23  ;;  %v3264_v51 = vpack.c.bf16 %v2600_v50, %v2599_v38 }
 0x2f9   : > { %v867_v28 = vpop.f32.mrf.mxu1  ;;  %2602 = vmatpush3.bf16.xpose.msra.mxu0 %v954_v23  ;;  %v3267_v53 = vpop.f32.mrf.mxu0 }
 0x2fa   : > { %2603 = vmatprep.subr.bf16.mxu0 %v953_v25 }
 0x2fb   : > { %v869_v30 = vpop.f32.mrf.mxu1 }
 0x2fc   : > { %v951_v31 = vpack.c.bf16 %v869_v30, %v865_v24 }
 0x2fd   : > { %v871_v34 = vpop.f32.mrf.mxu1 }
 0x2fe   : > { %2613 = vmatprep.mubr.bf16.mxu1 %v951_v31  ;;  %v955_v49 = vpack.c.bf16 %v871_v34, %v867_v28 }
 0x2ff   : > { %v875_v36 = vpop.f32.mrf.mxu1 }
 0x301   : > { %v877_v40 = vpop.f32.mrf.mxu1  ;;  %2604 = vmatpush3.bf16.xpose.msra.mxu0 %v953_v25 }
 0x302   : > { %2617 = vmatprep.subr.bf16.mxu0 %v958_v37 }
 0x303   : > { %v879_v41 = vpop.f32.mrf.mxu1 }
 0x304   : > { %v952_v52 = vpack.c.bf16 %v879_v41, %v875_v36 }
 0x305   : > { %v881_v43 = vpop.f32.mrf.mxu1 }
 0x306   : > { %v956_v45 = vpack.c.bf16 %v881_v43, %v877_v40 }
 0x308   : > { %2606 = vmatmul.mubr.bf16.vlgmr.msra.gmra.mxu0 %v950_v44  ;;  %2609 = vmatprep.subr.bf16.mxu1 %v956_v45 }
 0x309   : > { %2610 = vmatpush3.bf16.xpose.msra.mxu1 %v956_v45  ;;  %2618 = vmatpush3.bf16.msra.mxu0 %v958_v37 }
 0x30a   : > { %2611 = vmatprep.subr.bf16.mxu1 %v955_v49  ;;  %2619 = vmatprep.subr.bf16.mxu0 %v957_v48 }
 0x30d   : > { %2620 = vmatpush3.bf16.msra.mxu0 %v957_v48 }
 0x30e   : > { %2625 = vmatprep.subr.bf16.mxu0 %v3264_v51 }
 0x311   : > { %2612 = vmatpush3.bf16.xpose.msra.mxu1 %v955_v49 }
 0x318   : > { %2614 = vmatmul.mubr.bf16.vlgmr.msra.gmra.mxu1 %v952_v52 }
 0x3c8   : > { %v2607_v54 = vpop.f32.mrf.mxu0 }
 0x3c9   : > { %v1008_v61 = vadd.f32 %v2607_v54, %v963_v27 }
 0x3ca   : > { %v999_v57 = vpop.f32.mrf.mxu0 }
 0x3cb   : > { %v1000_v60 = vadd.f32 %v999_v57, %v961_v56  ;;  %v1070_v4 = vsel %vm1063_vm3, %v1008_v61, -inf }
 0x3cc   : > { %v2608_v29 = vpop.f32.mrf.mxu0 }
 0x3cd   : > { %v1064_v62 = vsel %vm1063_vm3, %v1000_v60, -inf  ;;  %v1011_v39 = vadd.f32 %v2608_v29, %v964_v0 }
 0x3ce   : > { %v1002_v35 = vpop.f32.mrf.mxu0  ;;  %1065 = vmax.xlane.f32.xlu0 %v1064_v62 }
 0x3cf   : > { %v1003_v2 = vadd.f32 %v1002_v35, %v962_v33  ;;  %v1073_v5 = vsel %vm1063_vm3, %v1011_v39, -inf }
 0x3d1   : > { %v1067_v3 = vsel %vm1063_vm3, %v1003_v2, -inf }
 0x3d2   : > { %1068 = vmax.xlane.f32.xlu1 %v1067_v3  ;;  %1071 = vmax.xlane.f32.xlu0 %v1070_v4 }
 0x3d6   : > { %1074 = vmax.xlane.f32.xlu1 %v1073_v5 }
 0x3d8   : > { %v2615_v6 = vpop.f32.mrf.mxu1 }
 0x3d9   : > { %v1057_v55 = vadd.f32 %v2615_v6, %v963_v27 }
 0x3da   : > { %v1048_v8 = vpop.f32.mrf.mxu1 }
 0x3db   : > { %v1049_v47 = vadd.f32 %v1048_v8, %v961_v56  ;;  %v1082_v18 = vsel %vm1063_vm3, %v1057_v55, -inf }
 0x3dc   : > { %v2616_v12 = vpop.f32.mrf.mxu1 }
 0x3dd   : > { %v1076_v13 = vsel %vm1063_vm3, %v1049_v47, -inf  ;;  %v1060_v16 = vadd.f32 %v2616_v12, %v964_v0 }
 0x3de   : > { %v1051_v14 = vpop.f32.mrf.mxu1  ;;  %1077 = vmax.xlane.f32.xlu0 %v1076_v13 }
 0x3df   : > { %v1052_v15 = vadd.f32 %v1051_v14, %v962_v33  ;;  %v1085_v19 = vsel %vm1063_vm3, %v1060_v16, -inf }
 0x3e1   : > { %v1079_v17 = vsel %vm1063_vm3, %v1052_v15, -inf }
 0x3e2   : > { %1080 = vmax.xlane.f32.xlu1 %v1079_v17  ;;  %1083 = vmax.xlane.f32.xlu0 %v1082_v18 }
 0x3e6   : > { %1086 = vmax.xlane.f32.xlu1 %v1085_v19 }
 0x457   : > { %v1066_v20 = vpop.xlane.xlu0 %1065 }
 0x458   : > { %v1088_v21 = vsub.f32 %v1000_v60, %v1066_v20 }
 0x45a   : > { %v1096_v22 = vmul.f32 1.442695, %v1088_v21 }
 0x45b   : > { %v1069_v23 = vpop.xlane.xlu1 %1068  ;;  %v1072_v24 = vpop.xlane.xlu0 %1071 }
 0x45c   : > { %2884 = vpow2.f32 %v1096_v22  ;;  %v1089_v25 = vsub.f32 %v1003_v2, %v1069_v23  ;;  %v1090_v26 = vsub.f32 %v1008_v61, %v1072_v24 }
 0x45e   : > { %v1098_v28 = vmul.f32 1.442695, %v1089_v25  ;;  %v1100_v30 = vmul.f32 1.442695, %v1090_v26  ;;  %v959_v26 = vpack.c.bf16 %v3267_v53, %v3262_v42 }
 0x45f   : > { %v1075_v31 = vpop.xlane.xlu1 %1074 }
 0x460   : > { %2886 = vpow2.f32 %v1098_v28  ;;  %v1091_v32 = vsub.f32 %v1011_v39, %v1075_v31  ;;  %v2772_v28 = vld [vmem:[%s3640_s7 + $0x38] sm:$0xff]  }
 0x461   : > { %2888 = vpow2.f32 %v1100_v30 }
 0x462   : > { %v1102_v34 = vmul.f32 1.442695, %v1091_v32 }
 0x464   : > { %2890 = vpow2.f32 %v1102_v34 }
 0x467   : > { %v1078_v36 = vpop.xlane.xlu0 %1077 }
 0x468   : > { %v1092_v37 = vsub.f32 %v1049_v47, %v1078_v36 }
 0x469   : > { %v2885_v38 = vpop.eup %2884 }
 0x46a   : > { %v1104_v40 = vmul.f32 1.442695, %v1092_v37  ;;  %v1112_v41 = vsel %vm1063_vm3, %v2885_v38, 0.0 }
 0x46b   : > { %v1081_v43 = vpop.xlane.xlu1 %1080  ;;  %1113 = vadd.xlane.f32.xlu0 %v1112_v41  ;;  %v1084_v44 = vpop.xlane.xlu0 %1083  ;;  %v2774_v41 = vld [vmem:[%s3640_s7 + $0x28] sm:$0xff]  }
 0x46c   : > { %2892 = vpow2.f32 %v1104_v40  ;;  %v1093_v45 = vsub.f32 %v1052_v15, %v1081_v43  ;;  %v1094_v48 = vsub.f32 %v1057_v55, %v1084_v44  ;;  %v2775_v43 = vld [vmem:[%s3640_s7 + $0x20] sm:$0xff]   ;;  %v2776_v44 = vld [vmem:[%s3640_s7 + $0x18] sm:$0xff]  }
 0x46d   : > { %v2887_v49 = vpop.eup %2886 }
 0x46e   : > { %v2889_v50 = vpop.eup %2888  ;;  %v1106_v52 = vmul.f32 1.442695, %v1093_v45  ;;  %v1108_v54 = vmul.f32 1.442695, %v1094_v48  ;;  %v1115_v56 = vsel %vm1063_vm3, %v2887_v49, 0.0  ;;  %v2777_v45 = vld [vmem:[%s3640_s7 + $0x10] sm:$0xff]  }
 0x46f   : > { %1116 = vadd.xlane.f32.xlu1 %v1115_v56  ;;  %v1087_v27 = vpop.xlane.xlu1 %1086  ;;  %v1118_v57 = vsel %vm1063_vm3, %v2889_v50, 0.0  ;;  %v2778_v48 = vld [vmem:[%s3640_s7 + $0x8] sm:$0xff]  }
 0x470   : > { %2894 = vpow2.f32 %v1106_v52  ;;  %v1095_v60 = vsub.f32 %v1060_v16, %v1087_v27  ;;  %1119 = vadd.xlane.f32.xlu0 %v1118_v57 }
 0x471   : > { %v2891_v29 = vpop.eup %2890  ;;  %2896 = vpow2.f32 %v1108_v54 }
 0x472   : > { %v1110_v33 = vmul.f32 1.442695, %v1095_v60  ;;  %v1121_v61 = vsel %vm1063_vm3, %v2891_v29, 0.0 }
 0x473   : > { %1122 = vadd.xlane.f32.xlu1 %v1121_v61 }
 0x474   : > { %2898 = vpow2.f32 %v1110_v33 }
 0x479   : > { %v2893_v62 = vpop.eup %2892 }
 0x47a   : > { %v1124_v0 = vsel %vm1063_vm3, %v2893_v62, 0.0 }
 0x47b   : > { %1125 = vadd.xlane.f32.xlu0 %v1124_v0 }
 0x47d   : > { %v2895_v35 = vpop.eup %2894 }
 0x47e   : > { %v2897_v2 = vpop.eup %2896  ;;  %v1127_v39 = vsel %vm1063_vm3, %v2895_v35, 0.0 }
 0x47f   : > { %1128 = vadd.xlane.f32.xlu1 %v1127_v39  ;;  %v1130_v3 = vsel %vm1063_vm3, %v2897_v2, 0.0  ;;  %v2785_v39 = vld [vmem:[%s3641_s8 + $0xec] ss:$16 sps:$4 sm:$0xff]  }
 0x480   : > { %1131 = vadd.xlane.f32.xlu0 %v1130_v3  ;;  %v2791_v3 = vld [vmem:[%s3641_s8 + $0xcc] ss:$16 sps:$4 sm:$0xff]  }
 0x481   : > { %v2899_v4 = vpop.eup %2898 }
 0x482   : > { %v1133_v5 = vsel %vm1063_vm3, %v2899_v4, 0.0 }
 0x483   : > { %1134 = vadd.xlane.f32.xlu1 %v1133_v5  ;;  %v2797_v5 = vld [vmem:[%s3641_s8 + $0xac] ss:$16 sps:$4 sm:$0xff]  }
 0x4f4   : > { %v1114_v6 = vpop.xlane.xlu0 %1113 }
 0x4f5   : > { %2900 = vrcp.f32 %v1114_v6  ;;  %v2795_v6 = vld [vmem:[%s3641_s8 + $0xa8] ss:$16 sps:$4 sm:$0xff]  }
 0x4f8   : > { %v1117_v8 = vpop.xlane.xlu1 %1116 }
 0x4f9   : > { %2902 = vrcp.f32 %v1117_v8  ;;  %v1120_v47 = vpop.xlane.xlu0 %1119  ;;  %v2803_v8 = vld [vmem:[%s3641_s8 + $0x8c] ss:$16 sps:$4 sm:$0xff]  }
 0x4fa   : > { %2904 = vrcp.f32 %v1120_v47  ;;  %v2801_v47 = vld [vmem:[%s3641_s8 + $0x88] ss:$16 sps:$4 sm:$0xff]  }
 0x4fc   : > { %v1123_v12 = vpop.xlane.xlu1 %1122 }
 0x4fd   : > { %2906 = vrcp.f32 %v1123_v12  ;;  %v2809_v12 = vld [vmem:[%s3641_s8 + $0x6c] ss:$16 sps:$4 sm:$0xff]  }
 0x502   : > { %v2901_v55 = vpop.eup %2900 }
 0x503   : > { %v1144_v15 = vmul.f32 %v2901_v55, %v2885_v38  ;;  %v2807_v55 = vld [vmem:[%s3641_s8 + $0x68] ss:$16 sps:$4 sm:$0xff]  }
 0x504   : > { %v1126_v13 = vpop.xlane.xlu0 %1125 }
 0x505   : > { %2908 = vrcp.f32 %v1126_v13  ;;  %v2815_v13 = vld [vmem:[%s3641_s8 + $0x4c] ss:$16 sps:$4 sm:$0xff]  }
 0x506   : > { %v2903_v14 = vpop.eup %2902 }
 0x507   : > { %v1145_v16 = vmul.f32 %v2903_v14, %v2887_v49  ;;  %v2905_v17 = vpop.eup %2904  ;;  %v2779_v49 = vld [vmem:[%s3640_s7] sm:$0xff]   ;;  %v2813_v14 = vld [vmem:[%s3641_s8 + $0x48] ss:$16 sps:$4 sm:$0xff]  }
 0x508   : > { %v1129_v18 = vpop.xlane.xlu1 %1128  ;;  %v1146_v22 = vmul.f32 %v2905_v17, %v2889_v50  ;;  %v2827_v17 = vld [vmem:[%s3641_s8 + $0xc] ss:$16 sps:$4 sm:$0xff]  }
 0x509   : > { %2910 = vrcp.f32 %v1129_v18  ;;  %v1132_v19 = vpop.xlane.xlu0 %1131  ;;  %v1152_v20 = vpack.c.bf16 %v1145_v16, %v1144_v15  ;;  %v2821_v15 = vld [vmem:[%s3641_s8 + $0x2c] ss:$16 sps:$4 sm:$0xff]   ;;  %v2819_v16 = vld [vmem:[%s3641_s8 + $0x28] ss:$16 sps:$4 sm:$0xff]  }
 0x50a   : > { %v2907_v21 = vpop.eup %2906  ;;  %2912 = vrcp.f32 %v1132_v19  ;;  %v2825_v18 = vld [vmem:[%s3641_s8 + $0x8] ss:$16 sps:$4 sm:$0xff]  }
 0x50b   : > { %2621 = vmatprep.mubr.msk.bf16.mxu0 %vm1063_vm3, %v1152_v20  ;;  %v1147_v23 = vmul.f32 %v2907_v21, %v2891_v29 }
 0x50c   : > { %v1135_v24 = vpop.xlane.xlu1 %1134 }
 0x50d   : > { %2914 = vrcp.f32 %v1135_v24  ;;  %v1153_v25 = vpack.c.bf16 %v1147_v23, %v1146_v22 }
 0x50f   : > { %2622 = vmatmul.mubr.msk.bf16.vlgmr.msra.gmra.mxu0 %vm1063_vm3, %v1153_v25 }
 0x510   : > { %2626 = vmatpush3.bf16.msra.mxu0 %v3264_v51  ;;  %v2773_v51 = vld [vmem:[%s3640_s7 + $0x30] sm:$0xff]  }
 0x511   : > { %2627 = vmatprep.subr.bf16.mxu0 %v959_v26 }
 0x512   : > { %v2909_v30 = vpop.eup %2908 }
 0x513   : > { %v1148_v32 = vmul.f32 %v2909_v30, %v2893_v62 }
 0x514   : > { %2628 = vmatpush3.bf16.msra.mxu0 %v959_v26 }
 0x515   : > { %2633 = vmatprep.subr.bf16.mxu0 %v2772_v28 }
 0x516   : > { %v2911_v31 = vpop.eup %2910 }
 0x517   : > { %v1149_v34 = vmul.f32 %v2911_v31, %v2895_v35  ;;  %v2913_v36 = vpop.eup %2912  ;;  %v2988_v35 = vmov 0.0  }
 0x518   : > { %v1150_v40 = vmul.f32 %v2913_v36, %v2897_v2  ;;  %2657 = vmatprep.subr.bf16.mxu1 %v2988_v35  ;;  %2665 = vmatprep.mubr.msk.bf16.mxu1 %vm2989_vm4, %v2988_v35  ;;  %v2783_v2 = vld [vmem:[%s3641_s8 + $0xe8] ss:$16 sps:$4 sm:$0xff]  }
 0x519   : > { %v1154_v37 = vpack.c.bf16 %v1149_v34, %v1148_v32 }
 0x51a   : > { %v2915_v38 = vpop.eup %2914 }
 0x51b   : > { %v1151_v42 = vmul.f32 %v2915_v38, %v2899_v4  ;;  %2629 = vmatprep.mubr.msk.bf16.mxu0 %vm1063_vm3, %v1154_v37  ;;  %v2789_v4 = vld [vmem:[%s3641_s8 + $0xc8] ss:$16 sps:$4 sm:$0xff]  }
 0x51d   : > { %v1155_v53 = vpack.c.bf16 %v1151_v42, %v1150_v40  ;;  %v2794_v42 = vld [vmem:[%s3641_s8 + $0xa4] ss:$16 sps:$4 sm:$0xff]  }
 0x51f   : > { %2630 = vmatmul.mubr.msk.bf16.vlgmr.msra.gmra.mxu0 %vm1063_vm3, %v1155_v53  ;;  %v2792_v53 = vld [vmem:[%s3641_s8 + $0xa0] ss:$16 sps:$4 sm:$0xff]  }
 0x520   : > { %2634 = vmatpush3.bf16.msra.mxu0 %v2772_v28 }
 0x521   : > { %2635 = vmatprep.subr.bf16.mxu0 %v2773_v51 }
 0x524   : > { %2636 = vmatpush3.bf16.msra.mxu0 %v2773_v51  ;;  %v2800_v51 = vld [vmem:[%s3641_s8 + $0x84] ss:$16 sps:$4 sm:$0xff]  }
 0x525   : > { %2637 = vmatprep.subr.bf16.mxu0 %v2774_v41 }
 0x528   : > { %2638 = vmatpush3.bf16.msra.mxu0 %v2774_v41  ;;  %v2806_v41 = vld [vmem:[%s3641_s8 + $0x64] ss:$16 sps:$4 sm:$0xff]  }
 0x529   : > { %2639 = vmatprep.subr.bf16.mxu0 %v2775_v43 }
 0x52c   : > { %2640 = vmatpush3.bf16.msra.mxu0 %v2775_v43  ;;  %v2804_v43 = vld [vmem:[%s3641_s8 + $0x60] ss:$16 sps:$4 sm:$0xff]  }
 0x52d   : > { %2641 = vmatprep.subr.bf16.mxu0 %v2776_v44 }
 0x530   : > { %2642 = vmatpush3.bf16.msra.mxu0 %v2776_v44  ;;  %v2812_v44 = vld [vmem:[%s3641_s8 + $0x44] ss:$16 sps:$4 sm:$0xff]  }
 0x531   : > { %2643 = vmatprep.subr.bf16.mxu0 %v2777_v45 }
 0x534   : > { %2644 = vmatpush3.bf16.msra.mxu0 %v2777_v45  ;;  %v2810_v45 = vld [vmem:[%s3641_s8 + $0x40] ss:$16 sps:$4 sm:$0xff]  }
 0x535   : > { %2645 = vmatprep.subr.bf16.mxu0 %v2778_v48 }
 0x538   : > { %2646 = vmatpush3.bf16.msra.mxu0 %v2778_v48  ;;  %v2818_v48 = vld [vmem:[%s3641_s8 + $0x24] ss:$16 sps:$4 sm:$0xff]  }
 0x539   : > { %2647 = vmatprep.subr.bf16.mxu0 %v2779_v49 }
 0x53c   : > { %2648 = vmatpush3.bf16.msra.mxu0 %v2779_v49  ;;  %v2816_v49 = vld [vmem:[%s3641_s8 + $0x20] ss:$16 sps:$4 sm:$0xff]  }
 0x53d   : > { %1712 = vmatprep.subr.bf16.mxu0 %v2785_v39  ;;  %v2834_v39 = vld [vmem:[%s3642_s9 + $0x30] sm:$0xff]  }
 0x5cf   : > { %v2623_v50 = vpop.f32.mrf.mxu0 }
 0x5d1   : > { %v1196_v52 = vpop.f32.mrf.mxu0 }
 0x5d3   : > { %v2624_v54 = vpop.f32.mrf.mxu0 }
 0x5d4   : > { %v1267_v57 = vpack.c.bf16 %v2624_v54, %v2623_v50  ;;  %v2824_v50 = vld [vmem:[%s3641_s8 + $0x4] ss:$16 sps:$4 sm:$0xff]  }
 0x5d5   : > { %v1199_v56 = vpop.f32.mrf.mxu0 }
 0x5d6   : > { %v1266_v27 = vpack.c.bf16 %v1199_v56, %v1196_v52  ;;  %v2822_v52 = vld [vmem:[%s3641_s8] ss:$16 sps:$4 sm:$0xff]  }
 0x5d8   : > { %2649 = vmatprep.mubr.bf16.mxu0 %v1266_v27 }
 0x5d9   : > { %2650 = vmatmul.mubr.bf16.vlgmr.msra.gmra.mxu0 %v1267_v57 }
 0x5da   : > { %1713 = vmatpush1.bf16.msra.mxu0 %v2783_v2  ;;  %v2833_v2 = vld [vmem:[%s3642_s9 + $0xf0] sm:$0xff]  }
 0x5db   : > { %1714 = vmatprep.subr.bf16.mxu0 %v2791_v3  ;;  %v2835_v3 = vld [vmem:[%s3642_s9 + $0xb0] sm:$0xff]  }
 0x5de   : > { %1715 = vmatpush1.bf16.msra.mxu0 %v2789_v4  ;;  %v2836_v4 = vld [vmem:[%s3642_s9 + $0x68] sm:$0xff]  }
 0x5df   : > { %v2631_v60 = vpop.f32.mrf.mxu0  ;;  %1716 = vmatprep.subr.bf16.mxu0 %v2797_v5  ;;  %v2837_v5 = vld [vmem:[%s3642_s9 + $0xe8] sm:$0xff]  }
 0x5e1   : > { %v1251_v29 = vpop.f32.mrf.mxu0 }
 0x5e2   : > { %1717 = vmatpush1.bf16.msra.mxu0 %v2795_v6  ;;  %v2838_v6 = vld [vmem:[%s3642_s9 + $0x28] sm:$0xff]  }
 0x5e3   : > { %v2632_v33 = vpop.f32.mrf.mxu0  ;;  %1718 = vmatprep.subr.bf16.mxu0 %v2803_v8  ;;  %v2839_v8 = vld [vmem:[%s3642_s9 + $0xa8] sm:$0xff]  }
 0x5e4   : > { %v1269_v0 = vpack.c.bf16 %v2632_v33, %v2631_v60  ;;  %v2829_v33 = vld [vmem:[%s3642_s9 + $0xf8] sm:$0xff]  }
 0x5e5   : > { %v1254_v61 = vpop.f32.mrf.mxu0 }
 0x5e6   : > { %v1268_v62 = vpack.c.bf16 %v1254_v61, %v1251_v29  ;;  %1719 = vmatpush1.bf16.msra.mxu0 %v2801_v47  ;;  %v2828_v29 = vld [vmem:[%s3642_s9 + $0x78] sm:$0xff]   ;;  %v2840_v47 = vld [vmem:[%s3642_s9 + $0x60] sm:$0xff]  }
 0x5e7   : > { %1720 = vmatprep.subr.bf16.mxu0 %v2809_v12  ;;  %v2830_v61 = vld [vmem:[%s3642_s9 + $0x38] sm:$0xff]   ;;  %v2841_v12 = vld [vmem:[%s3642_s9 + $0xe0] sm:$0xff]  }
 0x5e8   : > { %2653 = vmatprep.mubr.bf16.mxu0 %v1268_v62  ;;  %v2831_v62 = vld [vmem:[%s3642_s9 + $0xb8] sm:$0xff]  }
 0x5e9   : > { %2654 = vmatmul.mubr.bf16.gmra.mxu0 %v1269_v0  ;;  %v2832_v0 = vld [vmem:[%s3642_s9 + $0x70] sm:$0xff]  }
 0x5ea   : > { %1744 = vmatprep.mubr.bf16.mxu0 %v2987_v11  ;;  %1721 = vmatpush1.bf16.msra.mxu0 %v2807_v55  ;;  %v2842_v55 = vld [vmem:[%s3642_s9 + $0x20] sm:$0xff]  }
 0x5eb   : > { %1722 = vmatprep.subr.bf16.mxu0 %v2815_v13  ;;  %v2843_v13 = vld [vmem:[%s3642_s9 + $0xa0] sm:$0xff]  }
 0x5ee   : > { %1723 = vmatpush1.bf16.msra.mxu0 %v2813_v14  ;;  %v2844_v14 = vld [vmem:[%s3642_s9 + $0x58] sm:$0xff]  }
 0x5ef   : > { %1724 = vmatprep.subr.bf16.mxu0 %v2821_v15  ;;  %v2845_v15 = vld [vmem:[%s3642_s9 + $0xd8] sm:$0xff]  }
 0x5f2   : > { %1725 = vmatpush1.bf16.msra.mxu0 %v2819_v16  ;;  %v2846_v16 = vld [vmem:[%s3642_s9 + $0x18] sm:$0xff]  }
 0x5f3   : > { %1726 = vmatprep.subr.bf16.mxu0 %v2827_v17  ;;  %v2847_v17 = vld [vmem:[%s3642_s9 + $0x98] sm:$0xff]  }
 0x5f6   : > { %1727 = vmatpush1.bf16.msra.mxu0 %v2825_v18  ;;  %v2848_v18 = vld [vmem:[%s3642_s9 + $0x50] sm:$0xff]  }
 0x5f7   : > { %2530 = vmatprep.subr.bf16.mxu0 %v2829_v33 }
 0x699   : > { %v2651_v19 = vpop.f32.mrf.mxu0 }
 0x69a   : > { %v1401_v38 = vadd.f32 %v2651_v19, %v3238_v63  ;;  %v1407_v63 = vld [vmem:[%s3638_s5] sm:$0xf]  ;;  %v2849_v19 = vld [vmem:[%s3642_s9 + $0xd0] sm:$0xff]  }
 0x69b   : > { %v1368_v20 = vpop.f32.mrf.mxu0 }
 0x69c   : > { %v1399_v40 = vadd.f32 %v1368_v20, %v3231_v58  ;;  %v2788_v58 = vld [vmem:[%s3641_s8 + $0xc4] ss:$16 sps:$4 sm:$0xff]  }
 0x69d   : > { %v2652_v21 = vpop.f32.mrf.mxu0  ;;  %v2850_v20 = vld [vmem:[%s3642_s9 + $0x10] sm:$0xff]  }
 0x69e   : > { %v1402_v36 = vadd.f32 %v2652_v21, %v3241_v1  ;;  %v2786_v1 = vld [vmem:[%s3641_s8 + $0xc0] ss:$16 sps:$4 sm:$0xff]  }
 0x69f   : > { %v1371_v22 = vpop.f32.mrf.mxu0  ;;  %v2851_v21 = vld [vmem:[%s3642_s9 + $0x90] sm:$0xff]  }
 0x6a9   : > { %v2655_v23 = vpop.f32.mrf.mxu0 }
 0x6aa   : > { %v1405_v26 = vadd.f32 %v2655_v23, %v3254_v9  ;;  %v1409_v9 = vpack.c.bf16 %v1402_v36, %v1401_v38  ;;  %v2853_v23 = vld [vmem:[%s3642_s9 + $0xc8] sm:$0xff]   ;;  %v1489_v38 = vld [vmem:[%s3636_s3] sm:$0xf] }
 0x6ab   : > { %v1384_v24 = vpop.f32.mrf.mxu0 }
 0x6ac   : > { %v1403_v34 = vadd.f32 %v1384_v24, %v3248_v7  ;;  %v2782_v7 = vld [vmem:[%s3641_s8 + $0xe4] ss:$16 sps:$4 sm:$0xff]   ;;  %v2854_v24 = vld [vmem:[%s3642_s9 + $0x8] sm:$0xff]  }
 0x6ad   : > { %v2656_v25 = vpop.f32.mrf.mxu0 }
 0x6ae   : > { %v1406_v28 = vadd.f32 %v2656_v25, %v3256_v10  ;;  %v1400_v10 = vadd.f32 %v1371_v22, %v3233_v59  ;;  %v2780_v59 = vld [vmem:[%s3641_s8 + $0xe0] ss:$16 sps:$4 sm:$0xff]   ;;  %v2852_v22 = vld [vmem:[%s3642_s9 + $0x48] sm:$0xff]  }
 0x6af   : > { %v1387_v30 = vpop.f32.mrf.mxu0  ;;  %v2855_v25 = vld [vmem:[%s3642_s9 + $0x88] sm:$0xff]  }
 0x6b0   : > { %v1411_v31 = vpack.c.bf16 %v1406_v28, %v1405_v26  ;;  %v1404_v32 = vadd.f32 %v1387_v30, %v3250_v46  ;;  %v1408_v46 = vpack.c.bf16 %v1400_v10, %v1399_v40  ;;  %v2856_v26 = vld [vmem:[%s3642_s9 + $0x40] sm:$0xff]  }
 0x6b1   : > { %v2857_v28 = vld [vmem:[%s3642_s9 + $0xc0] sm:$0xff]  }
 0x6b2   : > { %2658 = vmatpush3.bf16.msra.mxu1 %v1411_v31  ;;  %v1410_v37 = vpack.c.bf16 %v1404_v32, %v1403_v34  ;;  %v2858_v30 = vld [vmem:[%s3642_s9] sm:$0xff]   ;;  %v1491_v32 = vlaneseq }
 0x6b3   : > { %2659 = vmatprep.subr.bf16.mxu1 %v2988_v35  ;;  %v2859_v31 = vld [vmem:[%s3642_s9 + $0x80] sm:$0xff]  }
 0x6b4   : > { %v1492_v34 = vshrl.u32 %v1491_v32, 7 }
 0x6b6   : > { %2660 = vmatpush3.bf16.msra.mxu1 %v1410_v37  ;;  %v1493_v36 = vsub.s32 0, %v1492_v34  ;;  %v1501_v37 = vsub.s32 2, %v1492_v34  ;;  %v1505_v10 = vsub.s32 3, %v1492_v34 }
 0x6b7   : > { %2661 = vmatprep.subr.bf16.mxu1 %v2988_v35 }
 0x6b8   : > { %v1494_v40 = vrot.slane %v1489_v38, %v1493_v36  ;;  %v2861_v36 = vld [vmem:[%s3643_s10 + $0x30] sm:$0xff]  }
 0x6ba   : > { %2662 = vmatpush3.bf16.msra.mxu1 %v1409_v9  ;;  %v1497_v9 = vsub.s32 1, %v1492_v34 }
 0x6bb   : > { %2663 = vmatprep.subr.bf16.mxu1 %v2988_v35 }
 0x6be   : > { %2664 = vmatpush3.bf16.msra.mxu1 %v1408_v46  ;;  %v1498_v46 = vrot.slane %v1489_v38, %v1497_v9  ;;  %v2864_v9 = vld [vmem:[%s3643_s10 + $0x18] sm:$0xff]  }
 0x6bf   : > { %1671 = vmatprep.subr.bf16.mxu1 %v2782_v7  ;;  %v1502_v7 = vrot.slane %v1489_v38, %v1501_v37  ;;  %v2862_v37 = vld [vmem:[%s3643_s10 + $0x28] sm:$0xff]  }
 0x6c1   : > { %2666 = vmatmul.mubr.msk.bf16.vlgmr.msra.gmra.mxu1 %vm1412_vm5, %v1407_v63  ;;  %v1506_v63 = vrot.slane %v1489_v38, %v1505_v10  ;;  %v2863_v38 = vld [vmem:[%s3643_s10 + $0x20] sm:$0xff]   ;;  %v2865_v10 = vld [vmem:[%s3643_s10 + $0x10] sm:$0xff]  }
 0x6c2   : > { %1672 = vmatpush1.bf16.msra.mxu1 %v2780_v59  ;;  %1703 = vmatprep.mubr.bf16.mxu1 %v2987_v11  ;;  %v2798_v11 = vld [vmem:[%s3641_s8 + $0x80] ss:$16 sps:$4 sm:$0xff]  }
 0x6c3   : > { %1673 = vmatprep.subr.bf16.mxu1 %v2788_v58 }
 0x6c6   : > { %1674 = vmatpush1.bf16.msra.mxu1 %v2786_v1 }
 0x6c7   : > { %1675 = vmatprep.subr.bf16.mxu1 %v2794_v42 }
 0x6ca   : > { %1676 = vmatpush1.bf16.msra.mxu1 %v2792_v53 }
 0x6cb   : > { %1677 = vmatprep.subr.bf16.mxu1 %v2800_v51 }
 0x6ce   : > { %1678 = vmatpush1.bf16.msra.mxu1 %v2798_v11 }
 0x6cf   : > { %1679 = vmatprep.subr.bf16.mxu1 %v2806_v41 }
 0x6d2   : > { %1680 = vmatpush1.bf16.msra.mxu1 %v2804_v43 }
 0x6d3   : > { %1681 = vmatprep.subr.bf16.mxu1 %v2812_v44 }
 0x6d6   : > { %1682 = vmatpush1.bf16.msra.mxu1 %v2810_v45 }
 0x6d7   : > { %1683 = vmatprep.subr.bf16.mxu1 %v2818_v48 }
 0x6da   : > { %1684 = vmatpush1.bf16.msra.mxu1 %v2816_v49 }
 0x6db   : > { %1685 = vmatprep.subr.bf16.mxu1 %v2824_v50 }
 0x6de   : > { %1686 = vmatpush1.bf16.msra.mxu1 %v2822_v52 }
 0x6df   : > { %2508 = vmatprep.subr.bf16.mxu1 %v2828_v29 }
 0x781   : > { %v3443_v54 = vpop.f32.mrf.mxu1 }
 0x782   : > { %v1456_v56 = vpack.c.bf16 %v3443_v54, %v3443_v54 }
 0x783   : > { %v2667_v27 = vpop.f32.mrf.mxu1 }
 0x784   : > { %1704 = vmatmul.mubr.bf16.vlgmr.msra.gmra.mxu1 %v1456_v56  ;;  %1745 = vmatmul.mubr.bf16.vlgmr.msra.gmra.mxu0 %v1456_v56 }
 0x785   : > { %v1453_v57 = vpop.f32.mrf.mxu1  ;;  %2509 = vmatpush3.bf16.msra.mxu1 %v2830_v61  ;;  %2531 = vmatpush3.bf16.msra.mxu0 %v2831_v62 }
 0x786   : > { %2510 = vmatprep.subr.bf16.mxu1 %v2832_v0  ;;  %2532 = vmatprep.subr.bf16.mxu0 %v2833_v2 }
 0x787   : > { %v2668_v60 = vpop.f32.mrf.mxu1 }
 0x789   : > { %2511 = vmatpush3.bf16.msra.mxu1 %v2834_v39  ;;  %2533 = vmatpush3.bf16.msra.mxu0 %v2835_v3 }
 0x78a   : > { %2512 = vmatprep.subr.bf16.mxu1 %v2836_v4  ;;  %2534 = vmatprep.subr.bf16.mxu0 %v2837_v5 }
 0x78d   : > { %2513 = vmatpush3.bf16.msra.mxu1 %v2838_v6  ;;  %2535 = vmatpush3.bf16.msra.mxu0 %v2839_v8 }
 0x78e   : > { %2514 = vmatprep.subr.bf16.mxu1 %v2840_v47  ;;  %2536 = vmatprep.subr.bf16.mxu0 %v2841_v12 }
 0x791   : > { %2515 = vmatpush3.bf16.msra.mxu1 %v2842_v55  ;;  %2537 = vmatpush3.bf16.msra.mxu0 %v2843_v13 }
 0x792   : > { %2516 = vmatprep.subr.bf16.mxu1 %v2844_v14  ;;  %2538 = vmatprep.subr.bf16.mxu0 %v2845_v15 }
 0x795   : > { %2517 = vmatpush3.bf16.msra.mxu1 %v2846_v16  ;;  %2539 = vmatpush3.bf16.msra.mxu0 %v2847_v17 }
 0x796   : > { %2518 = vmatprep.subr.bf16.mxu1 %v2848_v18  ;;  %2540 = vmatprep.subr.bf16.mxu0 %v2849_v19 }
 0x799   : > { %2519 = vmatpush3.bf16.msra.mxu1 %v2850_v20  ;;  %2541 = vmatpush3.bf16.msra.mxu0 %v2851_v21 }
 0x79a   : > { %2520 = vmatprep.subr.bf16.mxu1 %v2852_v22  ;;  %2542 = vmatprep.subr.bf16.mxu0 %v2853_v23 }
 0x79d   : > { %2521 = vmatpush3.bf16.msra.mxu1 %v2854_v24  ;;  %2543 = vmatpush3.bf16.msra.mxu0 %v2855_v25 }
 0x79e   : > { %2522 = vmatprep.subr.bf16.mxu1 %v2856_v26  ;;  %2544 = vmatprep.subr.bf16.mxu0 %v2857_v28 }
 0x7a1   : > { %2523 = vmatpush3.bf16.msra.mxu1 %v2858_v30  ;;  %2545 = vmatpush3.bf16.msra.mxu0 %v2859_v31  ;;  %v2860_v30 = vld [vmem:[%s3643_s10 + $0x38] sm:$0xff]  }
 0x7a2   : > { %2669 = vmatprep.subr.bf16.mxu1 %v2988_v35 }
 0x844   : > { %v1705_v59 = vpop.f32.mrf.mxu1  ;;  %v1746_v58 = vpop.f32.mrf.mxu0 }
 0x845   : > { %v1706_v1 = vadd.f32 %v1705_v59, %v1494_v40  ;;  %v1747_v42 = vadd.f32 %v1746_v58, %v1502_v7  ;;  %v2866_v40 = vld [vmem:[%s3643_s10 + $0x8] sm:$0xff]   ;;  %v2867_v7 = vld [vmem:[%s3643_s10] sm:$0xff]  }
 0x846   : > { %v1707_v53 = vpop.f32.mrf.mxu1  ;;  %v1748_v51 = vpop.f32.mrf.mxu0 }
 0x847   : > { %v1753_v11 = vmul.f32 %v1706_v1, %v1706_v1  ;;  %v1755_v41 = vmul.f32 %v1747_v42, %v1747_v42  ;;  %v1708_v43 = vadd.f32 %v1707_v53, %v1498_v46  ;;  %v1749_v44 = vadd.f32 %v1748_v51, %v1506_v63 }
 0x848   : > { %v1709_v45 = vpop.f32.mrf.mxu1  ;;  %v1750_v48 = vpop.f32.mrf.mxu0 }
 0x849   : > { %v1757_v49 = vmul.f32 %v1753_v11, %v1706_v1  ;;  %v1759_v50 = vmul.f32 %v1755_v41, %v1747_v42  ;;  %v1754_v52 = vmul.f32 %v1708_v43, %v1708_v43  ;;  %v1756_v56 = vmul.f32 %v1749_v44, %v1749_v44 }
 0x84a   : > { %v1710_v27 = vpop.f32.mrf.mxu1  ;;  %v1751_v57 = vpop.f32.mrf.mxu0 }
 0x84b   : > { %v1761_v60 = vmul.f32 0.044715, %v1757_v49  ;;  %v1763_v29 = vmul.f32 0.044715, %v1759_v50  ;;  %v1758_v33 = vmul.f32 %v1754_v52, %v1708_v43  ;;  %v1760_v61 = vmul.f32 %v1756_v56, %v1749_v44  ;;  %v2441_v49 = vld [vmem:[%s3635_s2 + $0x3] ss:$0 sm:$0xff] }
 0x84d   : > { %v1765_v62 = vadd.f32 %v1761_v60, %v1706_v1  ;;  %v1767_v0 = vadd.f32 %v1763_v29, %v1747_v42  ;;  %v1762_v2 = vmul.f32 0.044715, %v1758_v33  ;;  %v1764_v39 = vmul.f32 0.044715, %v1760_v61 }
 0x84f   : > { %v1769_v3 = vmul.f32 0.7978846, %v1765_v62  ;;  %v1771_v4 = vmul.f32 0.7978846, %v1767_v0  ;;  %v1766_v5 = vadd.f32 %v1762_v2, %v1708_v43  ;;  %v1768_v6 = vadd.f32 %v1764_v39, %v1749_v44 }
 0x851   : > { %2916 = vtanh.f32 %v1769_v3  ;;  %v1770_v8 = vmul.f32 0.7978846, %v1766_v5  ;;  %v1772_v47 = vmul.f32 0.7978846, %v1768_v6 }
 0x852   : > { %2918 = vtanh.f32 %v1771_v4 }
 0x853   : > { %2920 = vtanh.f32 %v1770_v8 }
 0x854   : > { %2922 = vtanh.f32 %v1772_v47 }
 0x85e   : > { %v2917_v12 = vpop.eup %2916 }
 0x85f   : > { %v2919_v55 = vpop.eup %2918  ;;  %v1777_v13 = vadd.f32 1.0, %v2917_v12 }
 0x860   : > { %v2921_v14 = vpop.eup %2920  ;;  %v1779_v15 = vadd.f32 1.0, %v2919_v55 }
 0x861   : > { %v2923_v16 = vpop.eup %2922  ;;  %v1778_v17 = vadd.f32 1.0, %v2921_v14  ;;  %v1781_v18 = vmul.f32 0.5, %v1777_v13 }
 0x862   : > { %v1780_v19 = vadd.f32 1.0, %v2923_v16  ;;  %v1783_v20 = vmul.f32 0.5, %v1779_v15 }
 0x863   : > { %v1782_v21 = vmul.f32 0.5, %v1778_v17  ;;  %v1785_v23 = vmul.f32 %v1781_v18, %v1706_v1 }
 0x864   : > { %v1784_v22 = vmul.f32 0.5, %v1780_v19  ;;  %v1787_v25 = vmul.f32 %v1783_v20, %v1747_v42 }
 0x865   : > { %v1786_v24 = vmul.f32 %v1782_v21, %v1708_v43  ;;  %v1789_v32 = vpack.c.bf16 %v1785_v23, %v1785_v23 }
 0x866   : > { %v1788_v26 = vmul.f32 %v1784_v22, %v1749_v44  ;;  %v1791_v34 = vpack.c.bf16 %v1787_v25, %v1787_v25 }
 0x867   : > { %v1790_v28 = vpack.c.bf16 %v1786_v24, %v1786_v24 }
 0x868   : > { %v1792_v31 = vpack.c.bf16 %v1788_v26, %v1788_v26 }
 0x869   : > { %2081 = vmatprep.mubr.bf16.mxu1 %v1790_v28 }
 0x86a   : > { %2121 = vmatprep.mubr.bf16.mxu0 %v1792_v31  ;;  %2082 = vmatmul.mubr.bf16.vlgmr.msra.gmra.mxu1 %v1789_v32 }
 0x86b   : > { %2122 = vmatmul.mubr.bf16.vlgmr.msra.gmra.mxu0 %v1791_v34  ;;  %2670 = vmatpush3.bf16.msra.mxu1 %v2860_v30 }
 0x86c   : > { %2671 = vmatprep.subr.bf16.mxu1 %v2988_v35  ;;  %2685 = vmatprep.mubr.msk.bf16.mxu1 %vm2989_vm4, %v2988_v35 }
 0x86f   : > { %2672 = vmatpush3.bf16.msra.mxu1 %v2861_v36 }
 0x870   : > { %2673 = vmatprep.subr.bf16.mxu1 %v2988_v35 }
 0x873   : > { %2674 = vmatpush3.bf16.msra.mxu1 %v2862_v37 }
 0x874   : > { %2675 = vmatprep.subr.bf16.mxu1 %v2988_v35 }
 0x877   : > { %2676 = vmatpush3.bf16.msra.mxu1 %v2863_v38 }
 0x878   : > { %2677 = vmatprep.subr.bf16.mxu1 %v2988_v35 }
 0x87b   : > { %2678 = vmatpush3.bf16.msra.mxu1 %v2864_v9 }
 0x87c   : > { %2679 = vmatprep.subr.bf16.mxu1 %v2988_v35 }
 0x87f   : > { %2680 = vmatpush3.bf16.msra.mxu1 %v2865_v10 }
 0x880   : > { %2681 = vmatprep.subr.bf16.mxu1 %v2988_v35 }
 0x883   : > { %2682 = vmatpush3.bf16.msra.mxu1 %v2866_v40 }
 0x884   : > { %2683 = vmatprep.subr.bf16.mxu1 %v2988_v35  ;;  %v2440_v35 = vld [vmem:[%s3635_s2 + $0x2] ss:$0 sm:$0xff] }
 0x887   : > { %2684 = vmatpush3.bf16.msra.mxu1 %v2867_v7 }
 0x92a   : > { %v2524_v46 = vpop.f32.mrf.mxu1 }
 0x92b   : > { %v2546_v63 = vpop.f32.mrf.mxu0 }
 0x92c   : > { %v2525_v59 = vpop.f32.mrf.mxu1 }
 0x92d   : > { %v2526_v58 = vadd.f32 %v2525_v59, %v2524_v46  ;;  %v2547_v1 = vpop.f32.mrf.mxu0 }
 0x92e   : > { %v2548_v42 = vadd.f32 %v2547_v1, %v2546_v63  ;;  %v2527_v53 = vpop.f32.mrf.mxu1 }
 0x92f   : > { %v2549_v51 = vpop.f32.mrf.mxu0 }
 0x930   : > { %v2124_v11 = vadd.f32 %v2548_v42, %v2526_v58  ;;  %v2528_v41 = vpop.f32.mrf.mxu1 }
 0x931   : > { %v2550_v43 = vpop.f32.mrf.mxu0 }
 0x932   : > { %v2129_v44 = vadd.f32 %v2124_v11, %v3443_v54 }
 0x934   : > { %v2134_v45 = vadd.f32 %v2440_v35, %v2129_v44 }
 0x936   : > { %v2135_v48 = vpack.c.bf16 %v2134_v45, %v2134_v45 }
 0x938   : > { %2686 = vmatmul.mubr.bf16.vlgmr.msra.gmra.mxu1 %v2135_v48 }
 0x9f8   : > { %v2238_v50 = vpop.f32.mrf.mxu1 }
 0x9f9   : > { %v2239_v52 = vadd.f32 %v2441_v49, %v2238_v50 }
 0x9fa   : > { %v2687_v54 = vpop.f32.mrf.mxu1 }
 0x9fb   : > { %2244 = vst [vmem:[%s379_s14] sm:$0xff] %v2239_v52 }
 0x9fc   : > { %v2241_v56 = vpop.f32.mrf.mxu1 }
 0x9fd   : > { %2937 = shalt.err (!%p2934_p3)
}
 0x9fe   : > { %s2938_s12 = scalar_lea.hbm %s3592_s16, 128  ;;  %s2942_s14 = scalar_lea.hbm %s3644_s11, 256 }
 0x9ff   : > { %p2939_p4 = scmp.ne.s32.totalorder %s3592_s16, %s2938_s12  ;;  %p2943_p9 = scmp.lt.s32.totalorder %s3592_s16, %s3644_s11 }
 0xa00   : > { %p2944_p10 = scmp.lt.s32.totalorder %s2942_s14, %s2938_s12 }
 0xa01   : > { %p2940_p7 = pnand %p2939_p4, %p3089_p5 }
 0xa02   : > { %p2945_p11 = por %p2944_p10, %p2943_p9 }
 0xa03   : > { %p2941_p8 = pneg %p2940_p7 }
 0xa05   : > { %p2946_p12 = pnand %p2945_p11, %p2941_p8 }
 0xa07   : > { %2949 = shalt.err (!%p2946_p12)
}
 0xa08   : > { %2689 = dma.vmem_to_hbm [thread:$0]  (%p3089_p5), %s3594_s0, 128, %s3592_s16, %s2246_s22   ;;  %v2688_v27 = vpop.f32.mrf.mxu1 }
 0xa09 PF: > { %p2695_p13 = scmp.ge.s32.totalorder %s2984_s20, 2  ;;  %s2271_s24 = sand.u32 1, %s2972_s17  }
 0xa0a   : > { %s2272_s21 = scalar_lea.sflag [#allocation3], %s2271_s24 }
 0xa0b   : > { %p2692_p0 = pnand %p2695_p13, %p3093_p6 }
 0xa0d   : > { %p2693_p1 = pneg %p2692_p0 }
 0xa0f   : > { %2967 = dma.done.wait (%p2693_p1), %s2272_s21, 128  }
 0xa10   : > { %2969 = vsyncadd (%p2693_p1), %s2272_s21, 4294967168  ;;  %p21_p2 = scmp.ge.s32.totalorder %s3076_s23, 4   ;;  %s3651_s17 = smov %s2976_s18 }
 0xa11   : > { %s3652_s18 = smov %s2980_s19  ;;  %s3653_s19 = smov %s3087_s26 }
 0xa12   : > { %s3654_s20 = smov %s3076_s23  ;;  %23 = sbr.rel (!%p21_p2) target bundleno = 6 (0x6), region = 99 }
 0xa17   :  { %2277 = vsyncpa [#allocation3], 1 }
 0xa18   :  { %2279 = vsyncpa [#allocation3 + $0x1], 1 }

</bundles_post_ra>
